<compile_context>
chip_gen: v6e
topology: v6e:2x2x1
jax: 0.10.0
libtpu: 0.0.40
codegen_flags: <defaults>
</compile_context>

<pallas_src>
import functools

import jax
import jax.numpy as jnp
from jax import lax
from jax.experimental import pallas as pl
from jax.experimental.pallas import tpu as pltpu


def _downgrade_kernel(r_ref, c_ref, x_ref, w_ref, o_ref, xp_ref, *,
                      C, H, W, KH, KW, pad, ratio, off, Ho, Wo):
    """One batch element: pad -> packed depthwise conv -> MXU roll+decimate.

    r_ref, c_ref : SMEM (N, C) int32 shifts, pre-reduced mod H / mod W
    x_ref        : VMEM (1, C, H, W) float32 input tile
    w_ref        : VMEM (KH*KW, C*Wp) float32 lane-packed taps,
                   w_ref[u*KW+v, ch*Wp + x] = mtf[u, v, ch]
    o_ref        : VMEM (1, C, Ho, Wo) float32 output tile (lane-dense store)
    xp_ref       : VMEM (Hp, C*Wp + KW - 1) float32 packed padded slab
    """
    Hp = H + 2 * pad
    Wp = W + 2 * pad
    CWp = C * Wp
    LP = CWp + (KW - 1)          # extra lanes so every tap slice stays in-bounds
    n = pl.program_id(0)

    # ---- 1) replication padding into the channel-packed VMEM slab -----------
    # xp[row, ch*Wp + col] = edge-padded image of band ch (one HBM read total).
    xp_ref[...] = jnp.zeros((Hp, LP), jnp.float32)
    for ch in range(C):
        base = ch * Wp
        img = x_ref[0, ch]                                          # (H, W)
        xp_ref[pad:pad + H, base + pad:base + pad + W] = img
        xp_ref[pad:pad + H, base:base + pad] = jnp.broadcast_to(
            img[:, 0:1], (H, pad))
        xp_ref[pad:pad + H, base + pad + W:base + Wp] = jnp.broadcast_to(
            img[:, W - 1:W], (H, pad))
    trow = xp_ref[pad:pad + 1, :]                                   # (1, LP)
    brow = xp_ref[pad + H - 1:pad + H, :]                           # (1, LP)
    xp_ref[0:pad, :] = jnp.broadcast_to(trow, (pad, LP))
    xp_ref[pad + H:Hp, :] = jnp.broadcast_to(brow, (pad, LP))

    # ---- 2) depthwise "valid" conv, all bands in one lane-packed slab -------
    # acc[i, ch*Wp + x] = conv[ch, i, x]  (lanes x >= W per band are junk).
    acc = jnp.zeros((H, CWp), jnp.float32)
    for u in range(KH):
        for v in range(KW):
            t = u * KW + v
            acc = acc + xp_ref[u:u + H, v:v + CWp] * w_ref[t:t + 1, :]

    # ---- 3) fused fineshift (circular roll by (r, c)) + [off::ratio] --------
    # out[i, j] = conv[(off + ratio*i - r) mod H, (off + ratio*j - c) mod W]
    # r, c are pre-reduced into [0, H) / [0, W), so the mod collapses to
    # "e or e + H" and the one-hot selection matrices feed two tiny MXU
    # matmuls per band (f32 passes -> exact for one-hot selection).
    hi = lax.broadcasted_iota(jnp.int32, (Ho, H), 1)   # source row h
    ii = lax.broadcasted_iota(jnp.int32, (Ho, H), 0)   # output row i
    wj = lax.broadcasted_iota(jnp.int32, (W, Wo), 0)   # source col w
    jj = lax.broadcasted_iota(jnp.int32, (W, Wo), 1)   # output col j

    for ch in range(C):
        r_s = r_ref[n, ch]
        c_s = c_ref[n, ch]

        e = off + ratio * ii - r_s
        rsel = jnp.where((hi == e) | (hi == e + H), 1.0, 0.0)        # (Ho, H)
        f = off + ratio * jj - c_s
        cselT = jnp.where((wj == f) | (wj == f + W), 1.0, 0.0)       # (W, Wo)

        acc_ch = acc[:, ch * Wp:ch * Wp + W]                         # (H, W)
        rows = jnp.dot(rsel, acc_ch, preferred_element_type=jnp.float32)   # (Ho, W)
        out_ch = jnp.dot(rows, cselT, preferred_element_type=jnp.float32)  # (Ho, Wo)
        o_ref[0, ch] = out_ch                            # lane-dense store per band


def downgrade_protocol(outputs_nchw, r, c, mtf, ratio):
    """Mirror of DowngradeProtocol.forward.

    outputs_nchw: (N, C, H, W) float32
    r, c:         (N, C) integer per-sample / per-band shifts
    mtf:          (KH, KW, C) float32 (same layout as the PyTorch `mtf` arg)
    """
    N, C, H, W = outputs_nchw.shape
    KH, KW, Cm = mtf.shape
    assert Cm == C, "mtf band count must match input channels"
    # The module derives one pad size from KH and pads both axes with it; we
    # assert the square/odd case it was written for instead of silently mismatching.
    assert KH == KW and KH % 2 == 1, "kernel assumes a square, odd-sized MTF"
    pad = (KH - 1) // 2
    off = 2  # hard-coded offset from `x[:, :, 2::ratio, 2::ratio]`
    assert H > off and W > off and ratio >= 1
    Ho = (H - off + ratio - 1) // ratio
    Wo = (W - off + ratio - 1) // ratio
    Wp = W + 2 * pad

    # Lane-packed taps: wtab[u*KW + v, ch*Wp + x] = mtf[u, v, ch].
    wtab = jnp.repeat(mtf.astype(jnp.float32).reshape(KH * KW, C), Wp, axis=1)

    # TODO(synk): `fineshift` is not defined in the provided source; assumed
    # semantics = per-band integer circular shift (torch.roll) by (r[b], c[b]).
    # Reduce shifts mod H / W here so the kernel's one-hot selection is mod-free.
    r_m = jnp.mod(r.astype(jnp.int32), H)
    c_m = jnp.mod(c.astype(jnp.int32), W)

    kernel = functools.partial(
        _downgrade_kernel, C=C, H=H, W=W, KH=KH, KW=KW,
        pad=pad, ratio=ratio, off=off, Ho=Ho, Wo=Wo)

    return pl.pallas_call(
        kernel,
        out_shape=jax.ShapeDtypeStruct((N, C, Ho, Wo), jnp.float32),
        grid_spec=pltpu.PrefetchScalarGridSpec(
            num_scalar_prefetch=2,           # r, c land in SMEM
            grid=(N,),
            in_specs=[
                pl.BlockSpec((1, C, H, W), lambda n, r_ref, c_ref: (n, 0, 0, 0)),
                pl.BlockSpec((KH * KW, C * Wp), lambda n, r_ref, c_ref: (0, 0)),
            ],
            out_specs=pl.BlockSpec((1, C, Ho, Wo),
                                   lambda n, r_ref, c_ref: (n, 0, 0, 0)),
            scratch_shapes=[
                pltpu.VMEM((H + 2 * pad, C * Wp + KW - 1), jnp.float32)],
        ),
        compiler_params=pltpu.CompilerParams(dimension_semantics=("parallel",)),
    )(r_m, c_m, outputs_nchw.astype(jnp.float32), wtab)


if __name__ == "__main__":
    N, C, H, W = 2, 4, 16, 16
    KH = KW = 7
    ratio = 4

    # Deterministic MTF-like filter bank: per-band normalized Gaussians, (KH, KW, C).
    yy, xx = jnp.meshgrid(
        jnp.arange(KH, dtype=jnp.float32) - KH // 2,
        jnp.arange(KW, dtype=jnp.float32) - KW // 2,
        indexing="ij",
    )
    sigmas = jnp.array([1.0, 1.5, 2.0, 2.5], dtype=jnp.float32)
    g = jnp.exp(-(yy[..., None] ** 2 + xx[..., None] ** 2) / (2.0 * sigmas ** 2))
    mtf = (g / jnp.sum(g, axis=(0, 1), keepdims=True)).astype(jnp.float32)

    key = jax.random.PRNGKey(0)
    k1, k2, k3 = jax.random.split(key, 3)
    x = jax.random.normal(k1, (N, C, H, W), dtype=jnp.float32)
    r = jax.random.randint(k2, (N, C), -2, 3)
    c = jax.random.randint(k3, (N, C), -2, 3)

    fwd = jax.jit(downgrade_protocol, static_argnums=(4,))
    out = jax.block_until_ready(fwd(x, r, c, mtf, ratio))

    # Pure-JAX reference (same accumulation order) for a sanity check.
    pad = (KH - 1) // 2
    xp = jnp.pad(x, ((0, 0), (0, 0), (pad,) * 2, (pad,) * 2), mode="edge")
    ref = jnp.zeros((N, C, H, W), jnp.float32)
    for u in range(KH):
        for v in range(KW):
            ref = ref + xp[:, :, u:u + H, v:v + W] * mtf[u, v, :][None, :, None, None]

    def _shift_one(img, rb, cb):
        return jax.vmap(
            lambda band, rs, cs: jnp.roll(jnp.roll(band, rs, axis=0), cs, axis=1)
        )(img, rb, cb)

    ref = jax.vmap(_shift_one)(ref, r, c)[:, :, 2::ratio, 2::ratio]

    assert out.shape == (N, C, 4, 4), out.shape
    assert jnp.allclose(out, ref, rtol=1e-5, atol=1e-5), float(jnp.max(jnp.abs(out - ref)))
    print("KERNEL_OK")
</pallas_src>

<mosaic_0001>
module attributes {stable_mosaic.version = 11 : i64} {
  func.func @_downgrade_kernel(%arg0: i32, %arg1: memref<2x4xi32, #tpu.memory_space<smem>>, %arg2: memref<2x4xi32, #tpu.memory_space<smem>>, %arg3: memref<1x4x16x16xf32, #tpu.memory_space<vmem>>, %arg4: memref<49x88xf32, #tpu.memory_space<vmem>>, %arg5: memref<1x4x4x4xf32, #tpu.memory_space<vmem>>, %arg6: memref<22x94xf32, #tpu.memory_space<vmem>>) attributes {dimension_semantics = [#tpu.dimension_semantics<parallel>], iteration_bounds = array<i64: 2>, scalar_prefetch = 2 : i64, scratch_operands = 1 : i64, tpu.core_type = #tpu.core_type<tc>, window_params = [{transform_indices = @transform_0, window_bounds = array<i64: 1, 4, 16, 16>}, {pipeline_mode = #tpu.pipeline_mode<synchronous>, transform_indices = @transform_1, window_bounds = array<i64: 49, 88>}, {transform_indices = @transform_2, window_bounds = array<i64: 1, 4, 4, 4>}]} {
    %cst = arith.constant 0.000000e+00 : f32
    %0 = vector.broadcast %cst : f32 to vector<22x94xf32>
    %c0 = arith.constant 0 : index
    %c0_0 = arith.constant 0 : index
    %1 = vector.load %arg6[%c0, %c0_0] : memref<22x94xf32, #tpu.memory_space<vmem>>, vector<22x94xf32>
    tpu.vector_store %arg6[%c0, %c0_0], %0 {strides = array<i32>} : memref<22x94xf32, #tpu.memory_space<vmem>>, vector<22x94xf32>,
    %c0_1 = arith.constant 0 : index
    %c0_2 = arith.constant 0 : index
    %c0_3 = arith.constant 0 : index
    %c0_4 = arith.constant 0 : index
    %2 = vector.load %arg3[%c0_1, %c0_2, %c0_3, %c0_4] : memref<1x4x16x16xf32, #tpu.memory_space<vmem>>, vector<1x1x16x16xf32>
    %3 = vector.shape_cast %2 : vector<1x1x16x16xf32> to vector<16x16xf32>
    %c3 = arith.constant 3 : index
    %c3_5 = arith.constant 3 : index
    %4 = vector.load %arg6[%c3, %c3_5] : memref<22x94xf32, #tpu.memory_space<vmem>>, vector<16x16xf32>
    tpu.vector_store %arg6[%c3, %c3_5], %3 {strides = array<i32>} : memref<22x94xf32, #tpu.memory_space<vmem>>, vector<16x16xf32>,
    %5 = vector.extract_strided_slice %3 {offsets = [0, 0], sizes = [16, 1], strides = [1, 1]} : vector<16x16xf32> to vector<16x1xf32>
    %6 = vector.shape_cast %5 : vector<16x1xf32> to vector<16x1xf32>
    %7 = vector.broadcast %6 : vector<16x1xf32> to vector<16x3xf32>
    %c3_6 = arith.constant 3 : index
    %c0_7 = arith.constant 0 : index
    %8 = vector.load %arg6[%c3_6, %c0_7] : memref<22x94xf32, #tpu.memory_space<vmem>>, vector<16x3xf32>
    tpu.vector_store %arg6[%c3_6, %c0_7], %7 {strides = array<i32>} : memref<22x94xf32, #tpu.memory_space<vmem>>, vector<16x3xf32>,
    %9 = vector.extract_strided_slice %3 {offsets = [0, 15], sizes = [16, 1], strides = [1, 1]} : vector<16x16xf32> to vector<16x1xf32>
    %10 = vector.shape_cast %9 : vector<16x1xf32> to vector<16x1xf32>
    %11 = vector.broadcast %10 : vector<16x1xf32> to vector<16x3xf32>
    %c3_8 = arith.constant 3 : index
    %c19 = arith.constant 19 : index
    %12 = vector.load %arg6[%c3_8, %c19] : memref<22x94xf32, #tpu.memory_space<vmem>>, vector<16x3xf32>
    tpu.vector_store %arg6[%c3_8, %c19], %11 {strides = array<i32>} : memref<22x94xf32, #tpu.memory_space<vmem>>, vector<16x3xf32>,
    %c0_9 = arith.constant 0 : index
    %c1 = arith.constant 1 : index
    %c0_10 = arith.constant 0 : index
    %c0_11 = arith.constant 0 : index
    %13 = vector.load %arg3[%c0_9, %c1, %c0_10, %c0_11] : memref<1x4x16x16xf32, #tpu.memory_space<vmem>>, vector<1x1x16x16xf32>
    %14 = vector.shape_cast %13 : vector<1x1x16x16xf32> to vector<16x16xf32>
    %c3_12 = arith.constant 3 : index
    %c25 = arith.constant 25 : index
    %15 = vector.load %arg6[%c3_12, %c25] : memref<22x94xf32, #tpu.memory_space<vmem>>, vector<16x16xf32>
    tpu.vector_store %arg6[%c3_12, %c25], %14 {strides = array<i32>} : memref<22x94xf32, #tpu.memory_space<vmem>>, vector<16x16xf32>,
    %16 = vector.extract_strided_slice %14 {offsets = [0, 0], sizes = [16, 1], strides = [1, 1]} : vector<16x16xf32> to vector<16x1xf32>
    %17 = vector.shape_cast %16 : vector<16x1xf32> to vector<16x1xf32>
    %18 = vector.broadcast %17 : vector<16x1xf32> to vector<16x3xf32>
    %c3_13 = arith.constant 3 : index
    %c22 = arith.constant 22 : index
    %19 = vector.load %arg6[%c3_13, %c22] : memref<22x94xf32, #tpu.memory_space<vmem>>, vector<16x3xf32>
    tpu.vector_store %arg6[%c3_13, %c22], %18 {strides = array<i32>} : memref<22x94xf32, #tpu.memory_space<vmem>>, vector<16x3xf32>,
    %20 = vector.extract_strided_slice %14 {offsets = [0, 15], sizes = [16, 1], strides = [1, 1]} : vector<16x16xf32> to vector<16x1xf32>
    %21 = vector.shape_cast %20 : vector<16x1xf32> to vector<16x1xf32>
    %22 = vector.broadcast %21 : vector<16x1xf32> to vector<16x3xf32>
    %c3_14 = arith.constant 3 : index
    %c41 = arith.constant 41 : index
    %23 = vector.load %arg6[%c3_14, %c41] : memref<22x94xf32, #tpu.memory_space<vmem>>, vector<16x3xf32>
    tpu.vector_store %arg6[%c3_14, %c41], %22 {strides = array<i32>} : memref<22x94xf32, #tpu.memory_space<vmem>>, vector<16x3xf32>,
    %c0_15 = arith.constant 0 : index
    %c2 = arith.constant 2 : index
    %c0_16 = arith.constant 0 : index
    %c0_17 = arith.constant 0 : index
    %24 = vector.load %arg3[%c0_15, %c2, %c0_16, %c0_17] : memref<1x4x16x16xf32, #tpu.memory_space<vmem>>, vector<1x1x16x16xf32>
    %25 = vector.shape_cast %24 : vector<1x1x16x16xf32> to vector<16x16xf32>
    %c3_18 = arith.constant 3 : index
    %c47 = arith.constant 47 : index
    %26 = vector.load %arg6[%c3_18, %c47] : memref<22x94xf32, #tpu.memory_space<vmem>>, vector<16x16xf32>
    tpu.vector_store %arg6[%c3_18, %c47], %25 {strides = array<i32>} : memref<22x94xf32, #tpu.memory_space<vmem>>, vector<16x16xf32>,
    %27 = vector.extract_strided_slice %25 {offsets = [0, 0], sizes = [16, 1], strides = [1, 1]} : vector<16x16xf32> to vector<16x1xf32>
    %28 = vector.shape_cast %27 : vector<16x1xf32> to vector<16x1xf32>
    %29 = vector.broadcast %28 : vector<16x1xf32> to vector<16x3xf32>
    %c3_19 = arith.constant 3 : index
    %c44 = arith.constant 44 : index
    %30 = vector.load %arg6[%c3_19, %c44] : memref<22x94xf32, #tpu.memory_space<vmem>>, vector<16x3xf32>
    tpu.vector_store %arg6[%c3_19, %c44], %29 {strides = array<i32>} : memref<22x94xf32, #tpu.memory_space<vmem>>, vector<16x3xf32>,
    %31 = vector.extract_strided_slice %25 {offsets = [0, 15], sizes = [16, 1], strides = [1, 1]} : vector<16x16xf32> to vector<16x1xf32>
    %32 = vector.shape_cast %31 : vector<16x1xf32> to vector<16x1xf32>
    %33 = vector.broadcast %32 : vector<16x1xf32> to vector<16x3xf32>
    %c3_20 = arith.constant 3 : index
    %c63 = arith.constant 63 : index
    %34 = vector.load %arg6[%c3_20, %c63] : memref<22x94xf32, #tpu.memory_space<vmem>>, vector<16x3xf32>
    tpu.vector_store %arg6[%c3_20, %c63], %33 {strides = array<i32>} : memref<22x94xf32, #tpu.memory_space<vmem>>, vector<16x3xf32>,
    %c0_21 = arith.constant 0 : index
    %c3_22 = arith.constant 3 : index
    %c0_23 = arith.constant 0 : index
    %c0_24 = arith.constant 0 : index
    %35 = vector.load %arg3[%c0_21, %c3_22, %c0_23, %c0_24] : memref<1x4x16x16xf32, #tpu.memory_space<vmem>>, vector<1x1x16x16xf32>
    %36 = vector.shape_cast %35 : vector<1x1x16x16xf32> to vector<16x16xf32>
    %c3_25 = arith.constant 3 : index
    %c69 = arith.constant 69 : index
    %37 = vector.load %arg6[%c3_25, %c69] : memref<22x94xf32, #tpu.memory_space<vmem>>, vector<16x16xf32>
    tpu.vector_store %arg6[%c3_25, %c69], %36 {strides = array<i32>} : memref<22x94xf32, #tpu.memory_space<vmem>>, vector<16x16xf32>,
    %38 = vector.extract_strided_slice %36 {offsets = [0, 0], sizes = [16, 1], strides = [1, 1]} : vector<16x16xf32> to vector<16x1xf32>
    %39 = vector.shape_cast %38 : vector<16x1xf32> to vector<16x1xf32>
    %40 = vector.broadcast %39 : vector<16x1xf32> to vector<16x3xf32>
    %c3_26 = arith.constant 3 : index
    %c66 = arith.constant 66 : index
    %41 = vector.load %arg6[%c3_26, %c66] : memref<22x94xf32, #tpu.memory_space<vmem>>, vector<16x3xf32>
    tpu.vector_store %arg6[%c3_26, %c66], %40 {strides = array<i32>} : memref<22x94xf32, #tpu.memory_space<vmem>>, vector<16x3xf32>,
    %42 = vector.extract_strided_slice %36 {offsets = [0, 15], sizes = [16, 1], strides = [1, 1]} : vector<16x16xf32> to vector<16x1xf32>
    %43 = vector.shape_cast %42 : vector<16x1xf32> to vector<16x1xf32>
    %44 = vector.broadcast %43 : vector<16x1xf32> to vector<16x3xf32>
    %c3_27 = arith.constant 3 : index
    %c85 = arith.constant 85 : index
    %45 = vector.load %arg6[%c3_27, %c85] : memref<22x94xf32, #tpu.memory_space<vmem>>, vector<16x3xf32>
    tpu.vector_store %arg6[%c3_27, %c85], %44 {strides = array<i32>} : memref<22x94xf32, #tpu.memory_space<vmem>>, vector<16x3xf32>,
    %c3_28 = arith.constant 3 : index
    %c0_29 = arith.constant 0 : index
    %46 = vector.load %arg6[%c3_28, %c0_29] : memref<22x94xf32, #tpu.memory_space<vmem>>, vector<1x94xf32>
    %c18 = arith.constant 18 : index
    %c0_30 = arith.constant 0 : index
    %47 = vector.load %arg6[%c18, %c0_30] : memref<22x94xf32, #tpu.memory_space<vmem>>, vector<1x94xf32>
    %48 = vector.shape_cast %46 : vector<1x94xf32> to vector<1x94xf32>
    %49 = vector.broadcast %48 : vector<1x94xf32> to vector<3x94xf32>
    %c0_31 = arith.constant 0 : index
    %c0_32 = arith.constant 0 : index
    %50 = vector.load %arg6[%c0_31, %c0_32] : memref<22x94xf32, #tpu.memory_space<vmem>>, vector<3x94xf32>
    tpu.vector_store %arg6[%c0_31, %c0_32], %49 {strides = array<i32>} : memref<22x94xf32, #tpu.memory_space<vmem>>, vector<3x94xf32>,
    %51 = vector.shape_cast %47 : vector<1x94xf32> to vector<1x94xf32>
    %52 = vector.broadcast %51 : vector<1x94xf32> to vector<3x94xf32>
    %c19_33 = arith.constant 19 : index
    %c0_34 = arith.constant 0 : index
    %53 = vector.load %arg6[%c19_33, %c0_34] : memref<22x94xf32, #tpu.memory_space<vmem>>, vector<3x94xf32>
    tpu.vector_store %arg6[%c19_33, %c0_34], %52 {strides = array<i32>} : memref<22x94xf32, #tpu.memory_space<vmem>>, vector<3x94xf32>,
    %cst_35 = arith.constant 0.000000e+00 : f32
    %54 = vector.broadcast %cst_35 : f32 to vector<16x88xf32>
    %c0_36 = arith.constant 0 : index
    %c0_37 = arith.constant 0 : index
    %55 = vector.load %arg6[%c0_36, %c0_37] : memref<22x94xf32, #tpu.memory_space<vmem>>, vector<16x88xf32>
    %c0_38 = arith.constant 0 : index
    %c0_39 = arith.constant 0 : index
    %56 = vector.load %arg4[%c0_38, %c0_39] : memref<49x88xf32, #tpu.memory_space<vmem>>, vector<1x88xf32>
    %57 = vector.broadcast %56 : vector<1x88xf32> to vector<16x88xf32>
    %58 = arith.mulf %55, %57 : vector<16x88xf32>
    %59 = arith.addf %54, %58 : vector<16x88xf32>
    %c0_40 = arith.constant 0 : index
    %c1_41 = arith.constant 1 : index
    %60 = vector.load %arg6[%c0_40, %c1_41] : memref<22x94xf32, #tpu.memory_space<vmem>>, vector<16x88xf32>
    %c1_42 = arith.constant 1 : index
    %c0_43 = arith.constant 0 : index
    %61 = vector.load %arg4[%c1_42, %c0_43] : memref<49x88xf32, #tpu.memory_space<vmem>>, vector<1x88xf32>
    %62 = vector.broadcast %61 : vector<1x88xf32> to vector<16x88xf32>
    %63 = arith.mulf %60, %62 : vector<16x88xf32>
    %64 = arith.addf %59, %63 : vector<16x88xf32>
    %c0_44 = arith.constant 0 : index
    %c2_45 = arith.constant 2 : index
    %65 = vector.load %arg6[%c0_44, %c2_45] : memref<22x94xf32, #tpu.memory_space<vmem>>, vector<16x88xf32>
    %c2_46 = arith.constant 2 : index
    %c0_47 = arith.constant 0 : index
    %66 = vector.load %arg4[%c2_46, %c0_47] : memref<49x88xf32, #tpu.memory_space<vmem>>, vector<1x88xf32>
    %67 = vector.broadcast %66 : vector<1x88xf32> to vector<16x88xf32>
    %68 = arith.mulf %65, %67 : vector<16x88xf32>
    %69 = arith.addf %64, %68 : vector<16x88xf32>
    %c0_48 = arith.constant 0 : index
    %c3_49 = arith.constant 3 : index
    %70 = vector.load %arg6[%c0_48, %c3_49] : memref<22x94xf32, #tpu.memory_space<vmem>>, vector<16x88xf32>
    %c3_50 = arith.constant 3 : index
    %c0_51 = arith.constant 0 : index
    %71 = vector.load %arg4[%c3_50, %c0_51] : memref<49x88xf32, #tpu.memory_space<vmem>>, vector<1x88xf32>
    %72 = vector.broadcast %71 : vector<1x88xf32> to vector<16x88xf32>
    %73 = arith.mulf %70, %72 : vector<16x88xf32>
    %74 = arith.addf %69, %73 : vector<16x88xf32>
    %c0_52 = arith.constant 0 : index
    %c4 = arith.constant 4 : index
    %75 = vector.load %arg6[%c0_52, %c4] : memref<22x94xf32, #tpu.memory_space<vmem>>, vector<16x88xf32>
    %c4_53 = arith.constant 4 : index
    %c0_54 = arith.constant 0 : index
    %76 = vector.load %arg4[%c4_53, %c0_54] : memref<49x88xf32, #tpu.memory_space<vmem>>, vector<1x88xf32>
    %77 = vector.broadcast %76 : vector<1x88xf32> to vector<16x88xf32>
    %78 = arith.mulf %75, %77 : vector<16x88xf32>
    %79 = arith.addf %74, %78 : vector<16x88xf32>
    %c0_55 = arith.constant 0 : index
    %c5 = arith.constant 5 : index
    %80 = vector.load %arg6[%c0_55, %c5] : memref<22x94xf32, #tpu.memory_space<vmem>>, vector<16x88xf32>
    %c5_56 = arith.constant 5 : index
    %c0_57 = arith.constant 0 : index
    %81 = vector.load %arg4[%c5_56, %c0_57] : memref<49x88xf32, #tpu.memory_space<vmem>>, vector<1x88xf32>
    %82 = vector.broadcast %81 : vector<1x88xf32> to vector<16x88xf32>
    %83 = arith.mulf %80, %82 : vector<16x88xf32>
    %84 = arith.addf %79, %83 : vector<16x88xf32>
    %c0_58 = arith.constant 0 : index
    %c6 = arith.constant 6 : index
    %85 = vector.load %arg6[%c0_58, %c6] : memref<22x94xf32, #tpu.memory_space<vmem>>, vector<16x88xf32>
    %c6_59 = arith.constant 6 : index
    %c0_60 = arith.constant 0 : index
    %86 = vector.load %arg4[%c6_59, %c0_60] : memref<49x88xf32, #tpu.memory_space<vmem>>, vector<1x88xf32>
    %87 = vector.broadcast %86 : vector<1x88xf32> to vector<16x88xf32>
    %88 = arith.mulf %85, %87 : vector<16x88xf32>
    %89 = arith.addf %84, %88 : vector<16x88xf32>
    %c1_61 = arith.constant 1 : index
    %c0_62 = arith.constant 0 : index
    %90 = vector.load %arg6[%c1_61, %c0_62] : memref<22x94xf32, #tpu.memory_space<vmem>>, vector<16x88xf32>
    %c7 = arith.constant 7 : index
    %c0_63 = arith.constant 0 : index
    %91 = vector.load %arg4[%c7, %c0_63] : memref<49x88xf32, #tpu.memory_space<vmem>>, vector<1x88xf32>
    %92 = vector.broadcast %91 : vector<1x88xf32> to vector<16x88xf32>
    %93 = arith.mulf %90, %92 : vector<16x88xf32>
    %94 = arith.addf %89, %93 : vector<16x88xf32>
    %c1_64 = arith.constant 1 : index
    %c1_65 = arith.constant 1 : index
    %95 = vector.load %arg6[%c1_64, %c1_65] : memref<22x94xf32, #tpu.memory_space<vmem>>, vector<16x88xf32>
    %c8 = arith.constant 8 : index
    %c0_66 = arith.constant 0 : index
    %96 = vector.load %arg4[%c8, %c0_66] : memref<49x88xf32, #tpu.memory_space<vmem>>, vector<1x88xf32>
    %97 = vector.broadcast %96 : vector<1x88xf32> to vector<16x88xf32>
    %98 = arith.mulf %95, %97 : vector<16x88xf32>
    %99 = arith.addf %94, %98 : vector<16x88xf32>
    %c1_67 = arith.constant 1 : index
    %c2_68 = arith.constant 2 : index
    %100 = vector.load %arg6[%c1_67, %c2_68] : memref<22x94xf32, #tpu.memory_space<vmem>>, vector<16x88xf32>
    %c9 = arith.constant 9 : index
    %c0_69 = arith.constant 0 : index
    %101 = vector.load %arg4[%c9, %c0_69] : memref<49x88xf32, #tpu.memory_space<vmem>>, vector<1x88xf32>
    %102 = vector.broadcast %101 : vector<1x88xf32> to vector<16x88xf32>
    %103 = arith.mulf %100, %102 : vector<16x88xf32>
    %104 = arith.addf %99, %103 : vector<16x88xf32>
    %c1_70 = arith.constant 1 : index
    %c3_71 = arith.constant 3 : index
    %105 = vector.load %arg6[%c1_70, %c3_71] : memref<22x94xf32, #tpu.memory_space<vmem>>, vector<16x88xf32>
    %c10 = arith.constant 10 : index
    %c0_72 = arith.constant 0 : index
    %106 = vector.load %arg4[%c10, %c0_72] : memref<49x88xf32, #tpu.memory_space<vmem>>, vector<1x88xf32>
    %107 = vector.broadcast %106 : vector<1x88xf32> to vector<16x88xf32>
    %108 = arith.mulf %105, %107 : vector<16x88xf32>
    %109 = arith.addf %104, %108 : vector<16x88xf32>
    %c1_73 = arith.constant 1 : index
    %c4_74 = arith.constant 4 : index
    %110 = vector.load %arg6[%c1_73, %c4_74] : memref<22x94xf32, #tpu.memory_space<vmem>>, vector<16x88xf32>
    %c11 = arith.constant 11 : index
    %c0_75 = arith.constant 0 : index
    %111 = vector.load %arg4[%c11, %c0_75] : memref<49x88xf32, #tpu.memory_space<vmem>>, vector<1x88xf32>
    %112 = vector.broadcast %111 : vector<1x88xf32> to vector<16x88xf32>
    %113 = arith.mulf %110, %112 : vector<16x88xf32>
    %114 = arith.addf %109, %113 : vector<16x88xf32>
    %c1_76 = arith.constant 1 : index
    %c5_77 = arith.constant 5 : index
    %115 = vector.load %arg6[%c1_76, %c5_77] : memref<22x94xf32, #tpu.memory_space<vmem>>, vector<16x88xf32>
    %c12 = arith.constant 12 : index
    %c0_78 = arith.constant 0 : index
    %116 = vector.load %arg4[%c12, %c0_78] : memref<49x88xf32, #tpu.memory_space<vmem>>, vector<1x88xf32>
    %117 = vector.broadcast %116 : vector<1x88xf32> to vector<16x88xf32>
    %118 = arith.mulf %115, %117 : vector<16x88xf32>
    %119 = arith.addf %114, %118 : vector<16x88xf32>
    %c1_79 = arith.constant 1 : index
    %c6_80 = arith.constant 6 : index
    %120 = vector.load %arg6[%c1_79, %c6_80] : memref<22x94xf32, #tpu.memory_space<vmem>>, vector<16x88xf32>
    %c13 = arith.constant 13 : index
    %c0_81 = arith.constant 0 : index
    %121 = vector.load %arg4[%c13, %c0_81] : memref<49x88xf32, #tpu.memory_space<vmem>>, vector<1x88xf32>
    %122 = vector.broadcast %121 : vector<1x88xf32> to vector<16x88xf32>
    %123 = arith.mulf %120, %122 : vector<16x88xf32>
    %124 = arith.addf %119, %123 : vector<16x88xf32>
    %c2_82 = arith.constant 2 : index
    %c0_83 = arith.constant 0 : index
    %125 = vector.load %arg6[%c2_82, %c0_83] : memref<22x94xf32, #tpu.memory_space<vmem>>, vector<16x88xf32>
    %c14 = arith.constant 14 : index
    %c0_84 = arith.constant 0 : index
    %126 = vector.load %arg4[%c14, %c0_84] : memref<49x88xf32, #tpu.memory_space<vmem>>, vector<1x88xf32>
    %127 = vector.broadcast %126 : vector<1x88xf32> to vector<16x88xf32>
    %128 = arith.mulf %125, %127 : vector<16x88xf32>
    %129 = arith.addf %124, %128 : vector<16x88xf32>
    %c2_85 = arith.constant 2 : index
    %c1_86 = arith.constant 1 : index
    %130 = vector.load %arg6[%c2_85, %c1_86] : memref<22x94xf32, #tpu.memory_space<vmem>>, vector<16x88xf32>
    %c15 = arith.constant 15 : index
    %c0_87 = arith.constant 0 : index
    %131 = vector.load %arg4[%c15, %c0_87] : memref<49x88xf32, #tpu.memory_space<vmem>>, vector<1x88xf32>
    %132 = vector.broadcast %131 : vector<1x88xf32> to vector<16x88xf32>
    %133 = arith.mulf %130, %132 : vector<16x88xf32>
    %134 = arith.addf %129, %133 : vector<16x88xf32>
    %c2_88 = arith.constant 2 : index
    %c2_89 = arith.constant 2 : index
    %135 = vector.load %arg6[%c2_88, %c2_89] : memref<22x94xf32, #tpu.memory_space<vmem>>, vector<16x88xf32>
    %c16 = arith.constant 16 : index
    %c0_90 = arith.constant 0 : index
    %136 = vector.load %arg4[%c16, %c0_90] : memref<49x88xf32, #tpu.memory_space<vmem>>, vector<1x88xf32>
    %137 = vector.broadcast %136 : vector<1x88xf32> to vector<16x88xf32>
    %138 = arith.mulf %135, %137 : vector<16x88xf32>
    %139 = arith.addf %134, %138 : vector<16x88xf32>
    %c2_91 = arith.constant 2 : index
    %c3_92 = arith.constant 3 : index
    %140 = vector.load %arg6[%c2_91, %c3_92] : memref<22x94xf32, #tpu.memory_space<vmem>>, vector<16x88xf32>
    %c17 = arith.constant 17 : index
    %c0_93 = arith.constant 0 : index
    %141 = vector.load %arg4[%c17, %c0_93] : memref<49x88xf32, #tpu.memory_space<vmem>>, vector<1x88xf32>
    %142 = vector.broadcast %141 : vector<1x88xf32> to vector<16x88xf32>
    %143 = arith.mulf %140, %142 : vector<16x88xf32>
    %144 = arith.addf %139, %143 : vector<16x88xf32>
    %c2_94 = arith.constant 2 : index
    %c4_95 = arith.constant 4 : index
    %145 = vector.load %arg6[%c2_94, %c4_95] : memref<22x94xf32, #tpu.memory_space<vmem>>, vector<16x88xf32>
    %c18_96 = arith.constant 18 : index
    %c0_97 = arith.constant 0 : index
    %146 = vector.load %arg4[%c18_96, %c0_97] : memref<49x88xf32, #tpu.memory_space<vmem>>, vector<1x88xf32>
    %147 = vector.broadcast %146 : vector<1x88xf32> to vector<16x88xf32>
    %148 = arith.mulf %145, %147 : vector<16x88xf32>
    %149 = arith.addf %144, %148 : vector<16x88xf32>
    %c2_98 = arith.constant 2 : index
    %c5_99 = arith.constant 5 : index
    %150 = vector.load %arg6[%c2_98, %c5_99] : memref<22x94xf32, #tpu.memory_space<vmem>>, vector<16x88xf32>
    %c19_100 = arith.constant 19 : index
    %c0_101 = arith.constant 0 : index
    %151 = vector.load %arg4[%c19_100, %c0_101] : memref<49x88xf32, #tpu.memory_space<vmem>>, vector<1x88xf32>
    %152 = vector.broadcast %151 : vector<1x88xf32> to vector<16x88xf32>
    %153 = arith.mulf %150, %152 : vector<16x88xf32>
    %154 = arith.addf %149, %153 : vector<16x88xf32>
    %c2_102 = arith.constant 2 : index
    %c6_103 = arith.constant 6 : index
    %155 = vector.load %arg6[%c2_102, %c6_103] : memref<22x94xf32, #tpu.memory_space<vmem>>, vector<16x88xf32>
    %c20 = arith.constant 20 : index
    %c0_104 = arith.constant 0 : index
    %156 = vector.load %arg4[%c20, %c0_104] : memref<49x88xf32, #tpu.memory_space<vmem>>, vector<1x88xf32>
    %157 = vector.broadcast %156 : vector<1x88xf32> to vector<16x88xf32>
    %158 = arith.mulf %155, %157 : vector<16x88xf32>
    %159 = arith.addf %154, %158 : vector<16x88xf32>
    %c3_105 = arith.constant 3 : index
    %c0_106 = arith.constant 0 : index
    %160 = vector.load %arg6[%c3_105, %c0_106] : memref<22x94xf32, #tpu.memory_space<vmem>>, vector<16x88xf32>
    %c21 = arith.constant 21 : index
    %c0_107 = arith.constant 0 : index
    %161 = vector.load %arg4[%c21, %c0_107] : memref<49x88xf32, #tpu.memory_space<vmem>>, vector<1x88xf32>
    %162 = vector.broadcast %161 : vector<1x88xf32> to vector<16x88xf32>
    %163 = arith.mulf %160, %162 : vector<16x88xf32>
    %164 = arith.addf %159, %163 : vector<16x88xf32>
    %c3_108 = arith.constant 3 : index
    %c1_109 = arith.constant 1 : index
    %165 = vector.load %arg6[%c3_108, %c1_109] : memref<22x94xf32, #tpu.memory_space<vmem>>, vector<16x88xf32>
    %c22_110 = arith.constant 22 : index
    %c0_111 = arith.constant 0 : index
    %166 = vector.load %arg4[%c22_110, %c0_111] : memref<49x88xf32, #tpu.memory_space<vmem>>, vector<1x88xf32>
    %167 = vector.broadcast %166 : vector<1x88xf32> to vector<16x88xf32>
    %168 = arith.mulf %165, %167 : vector<16x88xf32>
    %169 = arith.addf %164, %168 : vector<16x88xf32>
    %c3_112 = arith.constant 3 : index
    %c2_113 = arith.constant 2 : index
    %170 = vector.load %arg6[%c3_112, %c2_113] : memref<22x94xf32, #tpu.memory_space<vmem>>, vector<16x88xf32>
    %c23 = arith.constant 23 : index
    %c0_114 = arith.constant 0 : index
    %171 = vector.load %arg4[%c23, %c0_114] : memref<49x88xf32, #tpu.memory_space<vmem>>, vector<1x88xf32>
    %172 = vector.broadcast %171 : vector<1x88xf32> to vector<16x88xf32>
    %173 = arith.mulf %170, %172 : vector<16x88xf32>
    %174 = arith.addf %169, %173 : vector<16x88xf32>
    %c3_115 = arith.constant 3 : index
    %c3_116 = arith.constant 3 : index
    %175 = vector.load %arg6[%c3_115, %c3_116] : memref<22x94xf32, #tpu.memory_space<vmem>>, vector<16x88xf32>
    %c24 = arith.constant 24 : index
    %c0_117 = arith.constant 0 : index
    %176 = vector.load %arg4[%c24, %c0_117] : memref<49x88xf32, #tpu.memory_space<vmem>>, vector<1x88xf32>
    %177 = vector.broadcast %176 : vector<1x88xf32> to vector<16x88xf32>
    %178 = arith.mulf %175, %177 : vector<16x88xf32>
    %179 = arith.addf %174, %178 : vector<16x88xf32>
    %c3_118 = arith.constant 3 : index
    %c4_119 = arith.constant 4 : index
    %180 = vector.load %arg6[%c3_118, %c4_119] : memref<22x94xf32, #tpu.memory_space<vmem>>, vector<16x88xf32>
    %c25_120 = arith.constant 25 : index
    %c0_121 = arith.constant 0 : index
    %181 = vector.load %arg4[%c25_120, %c0_121] : memref<49x88xf32, #tpu.memory_space<vmem>>, vector<1x88xf32>
    %182 = vector.broadcast %181 : vector<1x88xf32> to vector<16x88xf32>
    %183 = arith.mulf %180, %182 : vector<16x88xf32>
    %184 = arith.addf %179, %183 : vector<16x88xf32>
    %c3_122 = arith.constant 3 : index
    %c5_123 = arith.constant 5 : index
    %185 = vector.load %arg6[%c3_122, %c5_123] : memref<22x94xf32, #tpu.memory_space<vmem>>, vector<16x88xf32>
    %c26 = arith.constant 26 : index
    %c0_124 = arith.constant 0 : index
    %186 = vector.load %arg4[%c26, %c0_124] : memref<49x88xf32, #tpu.memory_space<vmem>>, vector<1x88xf32>
    %187 = vector.broadcast %186 : vector<1x88xf32> to vector<16x88xf32>
    %188 = arith.mulf %185, %187 : vector<16x88xf32>
    %189 = arith.addf %184, %188 : vector<16x88xf32>
    %c3_125 = arith.constant 3 : index
    %c6_126 = arith.constant 6 : index
    %190 = vector.load %arg6[%c3_125, %c6_126] : memref<22x94xf32, #tpu.memory_space<vmem>>, vector<16x88xf32>
    %c27 = arith.constant 27 : index
    %c0_127 = arith.constant 0 : index
    %191 = vector.load %arg4[%c27, %c0_127] : memref<49x88xf32, #tpu.memory_space<vmem>>, vector<1x88xf32>
    %192 = vector.broadcast %191 : vector<1x88xf32> to vector<16x88xf32>
    %193 = arith.mulf %190, %192 : vector<16x88xf32>
    %194 = arith.addf %189, %193 : vector<16x88xf32>
    %c4_128 = arith.constant 4 : index
    %c0_129 = arith.constant 0 : index
    %195 = vector.load %arg6[%c4_128, %c0_129] : memref<22x94xf32, #tpu.memory_space<vmem>>, vector<16x88xf32>
    %c28 = arith.constant 28 : index
    %c0_130 = arith.constant 0 : index
    %196 = vector.load %arg4[%c28, %c0_130] : memref<49x88xf32, #tpu.memory_space<vmem>>, vector<1x88xf32>
    %197 = vector.broadcast %196 : vector<1x88xf32> to vector<16x88xf32>
    %198 = arith.mulf %195, %197 : vector<16x88xf32>
    %199 = arith.addf %194, %198 : vector<16x88xf32>
    %c4_131 = arith.constant 4 : index
    %c1_132 = arith.constant 1 : index
    %200 = vector.load %arg6[%c4_131, %c1_132] : memref<22x94xf32, #tpu.memory_space<vmem>>, vector<16x88xf32>
    %c29 = arith.constant 29 : index
    %c0_133 = arith.constant 0 : index
    %201 = vector.load %arg4[%c29, %c0_133] : memref<49x88xf32, #tpu.memory_space<vmem>>, vector<1x88xf32>
    %202 = vector.broadcast %201 : vector<1x88xf32> to vector<16x88xf32>
    %203 = arith.mulf %200, %202 : vector<16x88xf32>
    %204 = arith.addf %199, %203 : vector<16x88xf32>
    %c4_134 = arith.constant 4 : index
    %c2_135 = arith.constant 2 : index
    %205 = vector.load %arg6[%c4_134, %c2_135] : memref<22x94xf32, #tpu.memory_space<vmem>>, vector<16x88xf32>
    %c30 = arith.constant 30 : index
    %c0_136 = arith.constant 0 : index
    %206 = vector.load %arg4[%c30, %c0_136] : memref<49x88xf32, #tpu.memory_space<vmem>>, vector<1x88xf32>
    %207 = vector.broadcast %206 : vector<1x88xf32> to vector<16x88xf32>
    %208 = arith.mulf %205, %207 : vector<16x88xf32>
    %209 = arith.addf %204, %208 : vector<16x88xf32>
    %c4_137 = arith.constant 4 : index
    %c3_138 = arith.constant 3 : index
    %210 = vector.load %arg6[%c4_137, %c3_138] : memref<22x94xf32, #tpu.memory_space<vmem>>, vector<16x88xf32>
    %c31 = arith.constant 31 : index
    %c0_139 = arith.constant 0 : index
    %211 = vector.load %arg4[%c31, %c0_139] : memref<49x88xf32, #tpu.memory_space<vmem>>, vector<1x88xf32>
    %212 = vector.broadcast %211 : vector<1x88xf32> to vector<16x88xf32>
    %213 = arith.mulf %210, %212 : vector<16x88xf32>
    %214 = arith.addf %209, %213 : vector<16x88xf32>
    %c4_140 = arith.constant 4 : index
    %c4_141 = arith.constant 4 : index
    %215 = vector.load %arg6[%c4_140, %c4_141] : memref<22x94xf32, #tpu.memory_space<vmem>>, vector<16x88xf32>
    %c32 = arith.constant 32 : index
    %c0_142 = arith.constant 0 : index
    %216 = vector.load %arg4[%c32, %c0_142] : memref<49x88xf32, #tpu.memory_space<vmem>>, vector<1x88xf32>
    %217 = vector.broadcast %216 : vector<1x88xf32> to vector<16x88xf32>
    %218 = arith.mulf %215, %217 : vector<16x88xf32>
    %219 = arith.addf %214, %218 : vector<16x88xf32>
    %c4_143 = arith.constant 4 : index
    %c5_144 = arith.constant 5 : index
    %220 = vector.load %arg6[%c4_143, %c5_144] : memref<22x94xf32, #tpu.memory_space<vmem>>, vector<16x88xf32>
    %c33 = arith.constant 33 : index
    %c0_145 = arith.constant 0 : index
    %221 = vector.load %arg4[%c33, %c0_145] : memref<49x88xf32, #tpu.memory_space<vmem>>, vector<1x88xf32>
    %222 = vector.broadcast %221 : vector<1x88xf32> to vector<16x88xf32>
    %223 = arith.mulf %220, %222 : vector<16x88xf32>
    %224 = arith.addf %219, %223 : vector<16x88xf32>
    %c4_146 = arith.constant 4 : index
    %c6_147 = arith.constant 6 : index
    %225 = vector.load %arg6[%c4_146, %c6_147] : memref<22x94xf32, #tpu.memory_space<vmem>>, vector<16x88xf32>
    %c34 = arith.constant 34 : index
    %c0_148 = arith.constant 0 : index
    %226 = vector.load %arg4[%c34, %c0_148] : memref<49x88xf32, #tpu.memory_space<vmem>>, vector<1x88xf32>
    %227 = vector.broadcast %226 : vector<1x88xf32> to vector<16x88xf32>
    %228 = arith.mulf %225, %227 : vector<16x88xf32>
    %229 = arith.addf %224, %228 : vector<16x88xf32>
    %c5_149 = arith.constant 5 : index
    %c0_150 = arith.constant 0 : index
    %230 = vector.load %arg6[%c5_149, %c0_150] : memref<22x94xf32, #tpu.memory_space<vmem>>, vector<16x88xf32>
    %c35 = arith.constant 35 : index
    %c0_151 = arith.constant 0 : index
    %231 = vector.load %arg4[%c35, %c0_151] : memref<49x88xf32, #tpu.memory_space<vmem>>, vector<1x88xf32>
    %232 = vector.broadcast %231 : vector<1x88xf32> to vector<16x88xf32>
    %233 = arith.mulf %230, %232 : vector<16x88xf32>
    %234 = arith.addf %229, %233 : vector<16x88xf32>
    %c5_152 = arith.constant 5 : index
    %c1_153 = arith.constant 1 : index
    %235 = vector.load %arg6[%c5_152, %c1_153] : memref<22x94xf32, #tpu.memory_space<vmem>>, vector<16x88xf32>
    %c36 = arith.constant 36 : index
    %c0_154 = arith.constant 0 : index
    %236 = vector.load %arg4[%c36, %c0_154] : memref<49x88xf32, #tpu.memory_space<vmem>>, vector<1x88xf32>
    %237 = vector.broadcast %236 : vector<1x88xf32> to vector<16x88xf32>
    %238 = arith.mulf %235, %237 : vector<16x88xf32>
    %239 = arith.addf %234, %238 : vector<16x88xf32>
    %c5_155 = arith.constant 5 : index
    %c2_156 = arith.constant 2 : index
    %240 = vector.load %arg6[%c5_155, %c2_156] : memref<22x94xf32, #tpu.memory_space<vmem>>, vector<16x88xf32>
    %c37 = arith.constant 37 : index
    %c0_157 = arith.constant 0 : index
    %241 = vector.load %arg4[%c37, %c0_157] : memref<49x88xf32, #tpu.memory_space<vmem>>, vector<1x88xf32>
    %242 = vector.broadcast %241 : vector<1x88xf32> to vector<16x88xf32>
    %243 = arith.mulf %240, %242 : vector<16x88xf32>
    %244 = arith.addf %239, %243 : vector<16x88xf32>
    %c5_158 = arith.constant 5 : index
    %c3_159 = arith.constant 3 : index
    %245 = vector.load %arg6[%c5_158, %c3_159] : memref<22x94xf32, #tpu.memory_space<vmem>>, vector<16x88xf32>
    %c38 = arith.constant 38 : index
    %c0_160 = arith.constant 0 : index
    %246 = vector.load %arg4[%c38, %c0_160] : memref<49x88xf32, #tpu.memory_space<vmem>>, vector<1x88xf32>
    %247 = vector.broadcast %246 : vector<1x88xf32> to vector<16x88xf32>
    %248 = arith.mulf %245, %247 : vector<16x88xf32>
    %249 = arith.addf %244, %248 : vector<16x88xf32>
    %c5_161 = arith.constant 5 : index
    %c4_162 = arith.constant 4 : index
    %250 = vector.load %arg6[%c5_161, %c4_162] : memref<22x94xf32, #tpu.memory_space<vmem>>, vector<16x88xf32>
    %c39 = arith.constant 39 : index
    %c0_163 = arith.constant 0 : index
    %251 = vector.load %arg4[%c39, %c0_163] : memref<49x88xf32, #tpu.memory_space<vmem>>, vector<1x88xf32>
    %252 = vector.broadcast %251 : vector<1x88xf32> to vector<16x88xf32>
    %253 = arith.mulf %250, %252 : vector<16x88xf32>
    %254 = arith.addf %249, %253 : vector<16x88xf32>
    %c5_164 = arith.constant 5 : index
    %c5_165 = arith.constant 5 : index
    %255 = vector.load %arg6[%c5_164, %c5_165] : memref<22x94xf32, #tpu.memory_space<vmem>>, vector<16x88xf32>
    %c40 = arith.constant 40 : index
    %c0_166 = arith.constant 0 : index
    %256 = vector.load %arg4[%c40, %c0_166] : memref<49x88xf32, #tpu.memory_space<vmem>>, vector<1x88xf32>
    %257 = vector.broadcast %256 : vector<1x88xf32> to vector<16x88xf32>
    %258 = arith.mulf %255, %257 : vector<16x88xf32>
    %259 = arith.addf %254, %258 : vector<16x88xf32>
    %c5_167 = arith.constant 5 : index
    %c6_168 = arith.constant 6 : index
    %260 = vector.load %arg6[%c5_167, %c6_168] : memref<22x94xf32, #tpu.memory_space<vmem>>, vector<16x88xf32>
    %c41_169 = arith.constant 41 : index
    %c0_170 = arith.constant 0 : index
    %261 = vector.load %arg4[%c41_169, %c0_170] : memref<49x88xf32, #tpu.memory_space<vmem>>, vector<1x88xf32>
    %262 = vector.broadcast %261 : vector<1x88xf32> to vector<16x88xf32>
    %263 = arith.mulf %260, %262 : vector<16x88xf32>
    %264 = arith.addf %259, %263 : vector<16x88xf32>
    %c6_171 = arith.constant 6 : index
    %c0_172 = arith.constant 0 : index
    %265 = vector.load %arg6[%c6_171, %c0_172] : memref<22x94xf32, #tpu.memory_space<vmem>>, vector<16x88xf32>
    %c42 = arith.constant 42 : index
    %c0_173 = arith.constant 0 : index
    %266 = vector.load %arg4[%c42, %c0_173] : memref<49x88xf32, #tpu.memory_space<vmem>>, vector<1x88xf32>
    %267 = vector.broadcast %266 : vector<1x88xf32> to vector<16x88xf32>
    %268 = arith.mulf %265, %267 : vector<16x88xf32>
    %269 = arith.addf %264, %268 : vector<16x88xf32>
    %c6_174 = arith.constant 6 : index
    %c1_175 = arith.constant 1 : index
    %270 = vector.load %arg6[%c6_174, %c1_175] : memref<22x94xf32, #tpu.memory_space<vmem>>, vector<16x88xf32>
    %c43 = arith.constant 43 : index
    %c0_176 = arith.constant 0 : index
    %271 = vector.load %arg4[%c43, %c0_176] : memref<49x88xf32, #tpu.memory_space<vmem>>, vector<1x88xf32>
    %272 = vector.broadcast %271 : vector<1x88xf32> to vector<16x88xf32>
    %273 = arith.mulf %270, %272 : vector<16x88xf32>
    %274 = arith.addf %269, %273 : vector<16x88xf32>
    %c6_177 = arith.constant 6 : index
    %c2_178 = arith.constant 2 : index
    %275 = vector.load %arg6[%c6_177, %c2_178] : memref<22x94xf32, #tpu.memory_space<vmem>>, vector<16x88xf32>
    %c44_179 = arith.constant 44 : index
    %c0_180 = arith.constant 0 : index
    %276 = vector.load %arg4[%c44_179, %c0_180] : memref<49x88xf32, #tpu.memory_space<vmem>>, vector<1x88xf32>
    %277 = vector.broadcast %276 : vector<1x88xf32> to vector<16x88xf32>
    %278 = arith.mulf %275, %277 : vector<16x88xf32>
    %279 = arith.addf %274, %278 : vector<16x88xf32>
    %c6_181 = arith.constant 6 : index
    %c3_182 = arith.constant 3 : index
    %280 = vector.load %arg6[%c6_181, %c3_182] : memref<22x94xf32, #tpu.memory_space<vmem>>, vector<16x88xf32>
    %c45 = arith.constant 45 : index
    %c0_183 = arith.constant 0 : index
    %281 = vector.load %arg4[%c45, %c0_183] : memref<49x88xf32, #tpu.memory_space<vmem>>, vector<1x88xf32>
    %282 = vector.broadcast %281 : vector<1x88xf32> to vector<16x88xf32>
    %283 = arith.mulf %280, %282 : vector<16x88xf32>
    %284 = arith.addf %279, %283 : vector<16x88xf32>
    %c6_184 = arith.constant 6 : index
    %c4_185 = arith.constant 4 : index
    %285 = vector.load %arg6[%c6_184, %c4_185] : memref<22x94xf32, #tpu.memory_space<vmem>>, vector<16x88xf32>
    %c46 = arith.constant 46 : index
    %c0_186 = arith.constant 0 : index
    %286 = vector.load %arg4[%c46, %c0_186] : memref<49x88xf32, #tpu.memory_space<vmem>>, vector<1x88xf32>
    %287 = vector.broadcast %286 : vector<1x88xf32> to vector<16x88xf32>
    %288 = arith.mulf %285, %287 : vector<16x88xf32>
    %289 = arith.addf %284, %288 : vector<16x88xf32>
    %c6_187 = arith.constant 6 : index
    %c5_188 = arith.constant 5 : index
    %290 = vector.load %arg6[%c6_187, %c5_188] : memref<22x94xf32, #tpu.memory_space<vmem>>, vector<16x88xf32>
    %c47_189 = arith.constant 47 : index
    %c0_190 = arith.constant 0 : index
    %291 = vector.load %arg4[%c47_189, %c0_190] : memref<49x88xf32, #tpu.memory_space<vmem>>, vector<1x88xf32>
    %292 = vector.broadcast %291 : vector<1x88xf32> to vector<16x88xf32>
    %293 = arith.mulf %290, %292 : vector<16x88xf32>
    %294 = arith.addf %289, %293 : vector<16x88xf32>
    %c6_191 = arith.constant 6 : index
    %c6_192 = arith.constant 6 : index
    %295 = vector.load %arg6[%c6_191, %c6_192] : memref<22x94xf32, #tpu.memory_space<vmem>>, vector<16x88xf32>
    %c48 = arith.constant 48 : index
    %c0_193 = arith.constant 0 : index
    %296 = vector.load %arg4[%c48, %c0_193] : memref<49x88xf32, #tpu.memory_space<vmem>>, vector<1x88xf32>
    %297 = vector.broadcast %296 : vector<1x88xf32> to vector<16x88xf32>
    %298 = arith.mulf %295, %297 : vector<16x88xf32>
    %299 = arith.addf %294, %298 : vector<16x88xf32>
    %300 = tpu.iota {dimensions = array<i32: 1>} : vector<4x16xi32>
    %301 = tpu.iota {dimensions = array<i32: 0>} : vector<4x16xi32>
    %302 = tpu.iota {dimensions = array<i32: 0>} : vector<16x4xi32>
    %303 = tpu.iota {dimensions = array<i32: 1>} : vector<16x4xi32>
    %304 = arith.index_cast %arg0 : i32 to index
    %c0_194 = arith.constant 0 : index
    %305 = memref.load %arg1[%304, %c0_194] : memref<2x4xi32, #tpu.memory_space<smem>>
    %306 = arith.index_cast %arg0 : i32 to index
    %c0_195 = arith.constant 0 : index
    %307 = memref.load %arg2[%306, %c0_195] : memref<2x4xi32, #tpu.memory_space<smem>>
    %c4_i32 = arith.constant 4 : i32
    %308 = vector.broadcast %c4_i32 : i32 to vector<4x16xi32>
    %309 = arith.muli %308, %301 : vector<4x16xi32>
    %c2_i32 = arith.constant 2 : i32
    %310 = vector.broadcast %c2_i32 : i32 to vector<4x16xi32>
    %311 = arith.addi %310, %309 : vector<4x16xi32>
    %312 = vector.broadcast %305 : i32 to vector<4x16xi32>
    %313 = arith.subi %311, %312 : vector<4x16xi32>
    %314 = arith.cmpi eq, %300, %313 : vector<4x16xi32>
    %c16_i32 = arith.constant 16 : i32
    %315 = vector.broadcast %c16_i32 : i32 to vector<4x16xi32>
    %316 = arith.addi %313, %315 : vector<4x16xi32>
    %317 = arith.cmpi eq, %300, %316 : vector<4x16xi32>
    %318 = arith.ori %314, %317 : vector<4x16xi1>
    %cst_196 = arith.constant 1.000000e+00 : f32
    %cst_197 = arith.constant 0.000000e+00 : f32
    %319 = vector.broadcast %cst_196 : f32 to vector<4x16xf32>
    %320 = vector.broadcast %cst_197 : f32 to vector<4x16xf32>
    %321 = arith.select %318, %319, %320 : vector<4x16xi1>, vector<4x16xf32>
    %c4_i32_198 = arith.constant 4 : i32
    %322 = vector.broadcast %c4_i32_198 : i32 to vector<16x4xi32>
    %323 = arith.muli %322, %303 : vector<16x4xi32>
    %c2_i32_199 = arith.constant 2 : i32
    %324 = vector.broadcast %c2_i32_199 : i32 to vector<16x4xi32>
    %325 = arith.addi %324, %323 : vector<16x4xi32>
    %326 = vector.broadcast %307 : i32 to vector<16x4xi32>
    %327 = arith.subi %325, %326 : vector<16x4xi32>
    %328 = arith.cmpi eq, %302, %327 : vector<16x4xi32>
    %c16_i32_200 = arith.constant 16 : i32
    %329 = vector.broadcast %c16_i32_200 : i32 to vector<16x4xi32>
    %330 = arith.addi %327, %329 : vector<16x4xi32>
    %331 = arith.cmpi eq, %302, %330 : vector<16x4xi32>
    %332 = arith.ori %328, %331 : vector<16x4xi1>
    %cst_201 = arith.constant 1.000000e+00 : f32
    %cst_202 = arith.constant 0.000000e+00 : f32
    %333 = vector.broadcast %cst_201 : f32 to vector<16x4xf32>
    %334 = vector.broadcast %cst_202 : f32 to vector<16x4xf32>
    %335 = arith.select %332, %333, %334 : vector<16x4xi1>, vector<16x4xf32>
    %336 = vector.extract_strided_slice %299 {offsets = [0, 0], sizes = [16, 16], strides = [1, 1]} : vector<16x88xf32> to vector<16x16xf32>
    %cst_203 = arith.constant dense<0.000000e+00> : vector<4x16xf32>
    %337 = tpu.matmul %321, %336, %cst_203 {dimension_numbers = #tpu.dot_dimension_numbers<[1], [0], [0], [1], [0, 0, 1, 1], [], []>} : vector<4x16xf32>, vector<16x16xf32>, vector<4x16xf32> -> vector<4x16xf32>
    %cst_204 = arith.constant dense<0.000000e+00> : vector<4x4xf32>
    %338 = tpu.matmul %337, %335, %cst_204 {dimension_numbers = #tpu.dot_dimension_numbers<[1], [0], [0], [1], [0, 0, 1, 1], [], []>} : vector<4x16xf32>, vector<16x4xf32>, vector<4x4xf32> -> vector<4x4xf32>
    %c0_205 = arith.constant 0 : index
    %c0_206 = arith.constant 0 : index
    %c0_207 = arith.constant 0 : index
    %c0_208 = arith.constant 0 : index
    %339 = vector.load %arg5[%c0_205, %c0_206, %c0_207, %c0_208] : memref<1x4x4x4xf32, #tpu.memory_space<vmem>>, vector<1x1x4x4xf32>
    %340 = vector.shape_cast %339 : vector<1x1x4x4xf32> to vector<4x4xf32>
    %341 = vector.shape_cast %338 : vector<4x4xf32> to vector<1x1x4x4xf32>
    tpu.vector_store %arg5[%c0_205, %c0_206, %c0_207, %c0_208], %341 {strides = array<i32>} : memref<1x4x4x4xf32, #tpu.memory_space<vmem>>, vector<1x1x4x4xf32>,
    %342 = arith.index_cast %arg0 : i32 to index
    %c1_209 = arith.constant 1 : index
    %343 = memref.load %arg1[%342, %c1_209] : memref<2x4xi32, #tpu.memory_space<smem>>
    %344 = arith.index_cast %arg0 : i32 to index
    %c1_210 = arith.constant 1 : index
    %345 = memref.load %arg2[%344, %c1_210] : memref<2x4xi32, #tpu.memory_space<smem>>
    %c4_i32_211 = arith.constant 4 : i32
    %346 = vector.broadcast %c4_i32_211 : i32 to vector<4x16xi32>
    %347 = arith.muli %346, %301 : vector<4x16xi32>
    %c2_i32_212 = arith.constant 2 : i32
    %348 = vector.broadcast %c2_i32_212 : i32 to vector<4x16xi32>
    %349 = arith.addi %348, %347 : vector<4x16xi32>
    %350 = vector.broadcast %343 : i32 to vector<4x16xi32>
    %351 = arith.subi %349, %350 : vector<4x16xi32>
    %352 = arith.cmpi eq, %300, %351 : vector<4x16xi32>
    %c16_i32_213 = arith.constant 16 : i32
    %353 = vector.broadcast %c16_i32_213 : i32 to vector<4x16xi32>
    %354 = arith.addi %351, %353 : vector<4x16xi32>
    %355 = arith.cmpi eq, %300, %354 : vector<4x16xi32>
    %356 = arith.ori %352, %355 : vector<4x16xi1>
    %cst_214 = arith.constant 1.000000e+00 : f32
    %cst_215 = arith.constant 0.000000e+00 : f32
    %357 = vector.broadcast %cst_214 : f32 to vector<4x16xf32>
    %358 = vector.broadcast %cst_215 : f32 to vector<4x16xf32>
    %359 = arith.select %356, %357, %358 : vector<4x16xi1>, vector<4x16xf32>
    %c4_i32_216 = arith.constant 4 : i32
    %360 = vector.broadcast %c4_i32_216 : i32 to vector<16x4xi32>
    %361 = arith.muli %360, %303 : vector<16x4xi32>
    %c2_i32_217 = arith.constant 2 : i32
    %362 = vector.broadcast %c2_i32_217 : i32 to vector<16x4xi32>
    %363 = arith.addi %362, %361 : vector<16x4xi32>
    %364 = vector.broadcast %345 : i32 to vector<16x4xi32>
    %365 = arith.subi %363, %364 : vector<16x4xi32>
    %366 = arith.cmpi eq, %302, %365 : vector<16x4xi32>
    %c16_i32_218 = arith.constant 16 : i32
    %367 = vector.broadcast %c16_i32_218 : i32 to vector<16x4xi32>
    %368 = arith.addi %365, %367 : vector<16x4xi32>
    %369 = arith.cmpi eq, %302, %368 : vector<16x4xi32>
    %370 = arith.ori %366, %369 : vector<16x4xi1>
    %cst_219 = arith.constant 1.000000e+00 : f32
    %cst_220 = arith.constant 0.000000e+00 : f32
    %371 = vector.broadcast %cst_219 : f32 to vector<16x4xf32>
    %372 = vector.broadcast %cst_220 : f32 to vector<16x4xf32>
    %373 = arith.select %370, %371, %372 : vector<16x4xi1>, vector<16x4xf32>
    %374 = vector.extract_strided_slice %299 {offsets = [0, 22], sizes = [16, 16], strides = [1, 1]} : vector<16x88xf32> to vector<16x16xf32>
    %cst_221 = arith.constant dense<0.000000e+00> : vector<4x16xf32>
    %375 = tpu.matmul %359, %374, %cst_221 {dimension_numbers = #tpu.dot_dimension_numbers<[1], [0], [0], [1], [0, 0, 1, 1], [], []>} : vector<4x16xf32>, vector<16x16xf32>, vector<4x16xf32> -> vector<4x16xf32>
    %cst_222 = arith.constant dense<0.000000e+00> : vector<4x4xf32>
    %376 = tpu.matmul %375, %373, %cst_222 {dimension_numbers = #tpu.dot_dimension_numbers<[1], [0], [0], [1], [0, 0, 1, 1], [], []>} : vector<4x16xf32>, vector<16x4xf32>, vector<4x4xf32> -> vector<4x4xf32>
    %c0_223 = arith.constant 0 : index
    %c1_224 = arith.constant 1 : index
    %c0_225 = arith.constant 0 : index
    %c0_226 = arith.constant 0 : index
    %377 = vector.load %arg5[%c0_223, %c1_224, %c0_225, %c0_226] : memref<1x4x4x4xf32, #tpu.memory_space<vmem>>, vector<1x1x4x4xf32>
    %378 = vector.shape_cast %377 : vector<1x1x4x4xf32> to vector<4x4xf32>
    %379 = vector.shape_cast %376 : vector<4x4xf32> to vector<1x1x4x4xf32>
    tpu.vector_store %arg5[%c0_223, %c1_224, %c0_225, %c0_226], %379 {strides = array<i32>} : memref<1x4x4x4xf32, #tpu.memory_space<vmem>>, vector<1x1x4x4xf32>,
    %380 = arith.index_cast %arg0 : i32 to index
    %c2_227 = arith.constant 2 : index
    %381 = memref.load %arg1[%380, %c2_227] : memref<2x4xi32, #tpu.memory_space<smem>>
    %382 = arith.index_cast %arg0 : i32 to index
    %c2_228 = arith.constant 2 : index
    %383 = memref.load %arg2[%382, %c2_228] : memref<2x4xi32, #tpu.memory_space<smem>>
    %c4_i32_229 = arith.constant 4 : i32
    %384 = vector.broadcast %c4_i32_229 : i32 to vector<4x16xi32>
    %385 = arith.muli %384, %301 : vector<4x16xi32>
    %c2_i32_230 = arith.constant 2 : i32
    %386 = vector.broadcast %c2_i32_230 : i32 to vector<4x16xi32>
    %387 = arith.addi %386, %385 : vector<4x16xi32>
    %388 = vector.broadcast %381 : i32 to vector<4x16xi32>
    %389 = arith.subi %387, %388 : vector<4x16xi32>
    %390 = arith.cmpi eq, %300, %389 : vector<4x16xi32>
    %c16_i32_231 = arith.constant 16 : i32
    %391 = vector.broadcast %c16_i32_231 : i32 to vector<4x16xi32>
    %392 = arith.addi %389, %391 : vector<4x16xi32>
    %393 = arith.cmpi eq, %300, %392 : vector<4x16xi32>
    %394 = arith.ori %390, %393 : vector<4x16xi1>
    %cst_232 = arith.constant 1.000000e+00 : f32
    %cst_233 = arith.constant 0.000000e+00 : f32
    %395 = vector.broadcast %cst_232 : f32 to vector<4x16xf32>
    %396 = vector.broadcast %cst_233 : f32 to vector<4x16xf32>
    %397 = arith.select %394, %395, %396 : vector<4x16xi1>, vector<4x16xf32>
    %c4_i32_234 = arith.constant 4 : i32
    %398 = vector.broadcast %c4_i32_234 : i32 to vector<16x4xi32>
    %399 = arith.muli %398, %303 : vector<16x4xi32>
    %c2_i32_235 = arith.constant 2 : i32
    %400 = vector.broadcast %c2_i32_235 : i32 to vector<16x4xi32>
    %401 = arith.addi %400, %399 : vector<16x4xi32>
    %402 = vector.broadcast %383 : i32 to vector<16x4xi32>
    %403 = arith.subi %401, %402 : vector<16x4xi32>
    %404 = arith.cmpi eq, %302, %403 : vector<16x4xi32>
    %c16_i32_236 = arith.constant 16 : i32
    %405 = vector.broadcast %c16_i32_236 : i32 to vector<16x4xi32>
    %406 = arith.addi %403, %405 : vector<16x4xi32>
    %407 = arith.cmpi eq, %302, %406 : vector<16x4xi32>
    %408 = arith.ori %404, %407 : vector<16x4xi1>
    %cst_237 = arith.constant 1.000000e+00 : f32
    %cst_238 = arith.constant 0.000000e+00 : f32
    %409 = vector.broadcast %cst_237 : f32 to vector<16x4xf32>
    %410 = vector.broadcast %cst_238 : f32 to vector<16x4xf32>
    %411 = arith.select %408, %409, %410 : vector<16x4xi1>, vector<16x4xf32>
    %412 = vector.extract_strided_slice %299 {offsets = [0, 44], sizes = [16, 16], strides = [1, 1]} : vector<16x88xf32> to vector<16x16xf32>
    %cst_239 = arith.constant dense<0.000000e+00> : vector<4x16xf32>
    %413 = tpu.matmul %397, %412, %cst_239 {dimension_numbers = #tpu.dot_dimension_numbers<[1], [0], [0], [1], [0, 0, 1, 1], [], []>} : vector<4x16xf32>, vector<16x16xf32>, vector<4x16xf32> -> vector<4x16xf32>
    %cst_240 = arith.constant dense<0.000000e+00> : vector<4x4xf32>
    %414 = tpu.matmul %413, %411, %cst_240 {dimension_numbers = #tpu.dot_dimension_numbers<[1], [0], [0], [1], [0, 0, 1, 1], [], []>} : vector<4x16xf32>, vector<16x4xf32>, vector<4x4xf32> -> vector<4x4xf32>
    %c0_241 = arith.constant 0 : index
    %c2_242 = arith.constant 2 : index
    %c0_243 = arith.constant 0 : index
    %c0_244 = arith.constant 0 : index
    %415 = vector.load %arg5[%c0_241, %c2_242, %c0_243, %c0_244] : memref<1x4x4x4xf32, #tpu.memory_space<vmem>>, vector<1x1x4x4xf32>
    %416 = vector.shape_cast %415 : vector<1x1x4x4xf32> to vector<4x4xf32>
    %417 = vector.shape_cast %414 : vector<4x4xf32> to vector<1x1x4x4xf32>
    tpu.vector_store %arg5[%c0_241, %c2_242, %c0_243, %c0_244], %417 {strides = array<i32>} : memref<1x4x4x4xf32, #tpu.memory_space<vmem>>, vector<1x1x4x4xf32>,
    %418 = arith.index_cast %arg0 : i32 to index
    %c3_245 = arith.constant 3 : index
    %419 = memref.load %arg1[%418, %c3_245] : memref<2x4xi32, #tpu.memory_space<smem>>
    %420 = arith.index_cast %arg0 : i32 to index
    %c3_246 = arith.constant 3 : index
    %421 = memref.load %arg2[%420, %c3_246] : memref<2x4xi32, #tpu.memory_space<smem>>
    %c4_i32_247 = arith.constant 4 : i32
    %422 = vector.broadcast %c4_i32_247 : i32 to vector<4x16xi32>
    %423 = arith.muli %422, %301 : vector<4x16xi32>
    %c2_i32_248 = arith.constant 2 : i32
    %424 = vector.broadcast %c2_i32_248 : i32 to vector<4x16xi32>
    %425 = arith.addi %424, %423 : vector<4x16xi32>
    %426 = vector.broadcast %419 : i32 to vector<4x16xi32>
    %427 = arith.subi %425, %426 : vector<4x16xi32>
    %428 = arith.cmpi eq, %300, %427 : vector<4x16xi32>
    %c16_i32_249 = arith.constant 16 : i32
    %429 = vector.broadcast %c16_i32_249 : i32 to vector<4x16xi32>
    %430 = arith.addi %427, %429 : vector<4x16xi32>
    %431 = arith.cmpi eq, %300, %430 : vector<4x16xi32>
    %432 = arith.ori %428, %431 : vector<4x16xi1>
    %cst_250 = arith.constant 1.000000e+00 : f32
    %cst_251 = arith.constant 0.000000e+00 : f32
    %433 = vector.broadcast %cst_250 : f32 to vector<4x16xf32>
    %434 = vector.broadcast %cst_251 : f32 to vector<4x16xf32>
    %435 = arith.select %432, %433, %434 : vector<4x16xi1>, vector<4x16xf32>
    %c4_i32_252 = arith.constant 4 : i32
    %436 = vector.broadcast %c4_i32_252 : i32 to vector<16x4xi32>
    %437 = arith.muli %436, %303 : vector<16x4xi32>
    %c2_i32_253 = arith.constant 2 : i32
    %438 = vector.broadcast %c2_i32_253 : i32 to vector<16x4xi32>
    %439 = arith.addi %438, %437 : vector<16x4xi32>
    %440 = vector.broadcast %421 : i32 to vector<16x4xi32>
    %441 = arith.subi %439, %440 : vector<16x4xi32>
    %442 = arith.cmpi eq, %302, %441 : vector<16x4xi32>
    %c16_i32_254 = arith.constant 16 : i32
    %443 = vector.broadcast %c16_i32_254 : i32 to vector<16x4xi32>
    %444 = arith.addi %441, %443 : vector<16x4xi32>
    %445 = arith.cmpi eq, %302, %444 : vector<16x4xi32>
    %446 = arith.ori %442, %445 : vector<16x4xi1>
    %cst_255 = arith.constant 1.000000e+00 : f32
    %cst_256 = arith.constant 0.000000e+00 : f32
    %447 = vector.broadcast %cst_255 : f32 to vector<16x4xf32>
    %448 = vector.broadcast %cst_256 : f32 to vector<16x4xf32>
    %449 = arith.select %446, %447, %448 : vector<16x4xi1>, vector<16x4xf32>
    %450 = vector.extract_strided_slice %299 {offsets = [0, 66], sizes = [16, 16], strides = [1, 1]} : vector<16x88xf32> to vector<16x16xf32>
    %cst_257 = arith.constant dense<0.000000e+00> : vector<4x16xf32>
    %451 = tpu.matmul %435, %450, %cst_257 {dimension_numbers = #tpu.dot_dimension_numbers<[1], [0], [0], [1], [0, 0, 1, 1], [], []>} : vector<4x16xf32>, vector<16x16xf32>, vector<4x16xf32> -> vector<4x16xf32>
    %cst_258 = arith.constant dense<0.000000e+00> : vector<4x4xf32>
    %452 = tpu.matmul %451, %449, %cst_258 {dimension_numbers = #tpu.dot_dimension_numbers<[1], [0], [0], [1], [0, 0, 1, 1], [], []>} : vector<4x16xf32>, vector<16x4xf32>, vector<4x4xf32> -> vector<4x4xf32>
    %c0_259 = arith.constant 0 : index
    %c3_260 = arith.constant 3 : index
    %c0_261 = arith.constant 0 : index
    %c0_262 = arith.constant 0 : index
    %453 = vector.load %arg5[%c0_259, %c3_260, %c0_261, %c0_262] : memref<1x4x4x4xf32, #tpu.memory_space<vmem>>, vector<1x1x4x4xf32>
    %454 = vector.shape_cast %453 : vector<1x1x4x4xf32> to vector<4x4xf32>
    %455 = vector.shape_cast %452 : vector<4x4xf32> to vector<1x1x4x4xf32>
    tpu.vector_store %arg5[%c0_259, %c3_260, %c0_261, %c0_262], %455 {strides = array<i32>} : memref<1x4x4x4xf32, #tpu.memory_space<vmem>>, vector<1x1x4x4xf32>,
    return
  }
  func.func @transform_0(%arg0: i32, %arg1: memref<2x4xi32, #tpu.memory_space<smem>>, %arg2: memref<2x4xi32, #tpu.memory_space<smem>>) -> (i32, i32, i32, i32) {
    %c0_i32 = arith.constant 0 : i32
    %c0_i32_0 = arith.constant 0 : i32
    %c0_i32_1 = arith.constant 0 : i32
    %c0_i32_2 = arith.constant 0 : i32
    return %arg0, %c0_i32, %c0_i32_0, %c0_i32_1 : i32, i32, i32, i32
  }
  func.func @transform_1(%arg0: i32, %arg1: memref<2x4xi32, #tpu.memory_space<smem>>, %arg2: memref<2x4xi32, #tpu.memory_space<smem>>) -> (i32, i32) {
    %c0_i32 = arith.constant 0 : i32
    %c0_i32_0 = arith.constant 0 : i32
    %c0_i32_1 = arith.constant 0 : i32
    return %c0_i32, %c0_i32_0 : i32, i32
  }
  func.func @transform_2(%arg0: i32, %arg1: memref<2x4xi32, #tpu.memory_space<smem>>, %arg2: memref<2x4xi32, #tpu.memory_space<smem>>) -> (i32, i32, i32, i32) {
    %c0_i32 = arith.constant 0 : i32
    %c0_i32_0 = arith.constant 0 : i32
    %c0_i32_1 = arith.constant 0 : i32
    %c0_i32_2 = arith.constant 0 : i32
    return %arg0, %c0_i32, %c0_i32_0, %c0_i32_1 : i32, i32, i32, i32
  }
}

</mosaic_0001>

<bundles_post_ra>
// kernel: downgrade_protocol.1
= control target key start
LH: loop header
LB: loop body
LE: loop exit
PB: predicated region body
PF: predicated region fallthrough
CT: control target
= control target key end

     0   :  { %s3122_s0 = inlined_call_operand.vmem [shape: s32[2,4], index: 0, kind: input, shape index: {}]   ;;  %s3123_s2 = inlined_call_operand.vmem [shape: f32[2,4,16,16], index: 2, kind: input, shape index: {}]   ;;  %s3124_s3 = inlined_call_operand.vmem [shape: f32[49,88], index: 3, kind: input, shape index: {}]   ;;  %s3125_s4 = inlined_call_operand.hbm [shape: f32[2,4,4,4], index: 4, kind: output, shape index: {}]   ;;  %s3126_s1 = inlined_call_operand.vmem [shape: s32[2,4], index: 1, kind: input, shape index: {}]  }
   0x1   :  { %s9_s17 = sshll.u32 %s3122_s0, 4  ;;  %s13_s20 = sshll.u32 %s3126_s1, 4  ;;  %s10_s17 = int_to_ptr.vmem [resolvable:$true] %s9_s17  ;;  %s14_s20 = int_to_ptr.vmem [resolvable:$true] %s13_s20 }
   0x2   :  { %s2302_s21 = scalar_lea.vmem %s10_s17, 32  ;;  %p2307_p1 = scmp.lt.s32.totalorder %s10_s17, %s10_s17 }
   0x3   :  { %p2303_p0 = scmp.ne.s32.totalorder %s10_s17, %s2302_s21  ;;  %p2308_p2 = scmp.lt.s32.totalorder %s2302_s21, %s2302_s21 }
   0x5   :  { %p2309_p3 = por %p2308_p2, %p2307_p1 }
   0x7   :  { %p2310_p4 = pnand %p2309_p3, %p2303_p0 }
   0x9   :  { %2313 = shalt.err (!%p2310_p4)  }
   0xa   :  { %s2390_s22 = smov [#allocation4]   ;;  %s2314_s23 = scalar_lea.vmem %s14_s20, 32 }
   0xb   :  { %12 = dma.vmem_to_smem %s10_s17, 32, %s2390_s22, [#allocation3] }
   0xc   :  { %p2315_p5 = scmp.ne.s32.totalorder %s14_s20, %s2314_s23  ;;  %p2319_p6 = scmp.lt.s32.totalorder %s14_s20, %s14_s20 }
   0xd   :  { %p2320_p7 = scmp.lt.s32.totalorder %s2314_s23, %s2314_s23 }
   0xf   :  { %p2321_p8 = por %p2320_p7, %p2319_p6 }
  0x11   :  { %p2322_p9 = pnand %p2321_p8, %p2315_p5 }
  0x13   :  { %2325 = shalt.err (!%p2322_p9)  }
  0x14   :  { %s2391_s0 = smov [#allocation5]  }
  0x15   :  { %16 = dma.vmem_to_smem %s14_s20, 32, %s2391_s0, [#allocation3] }
  0x16   :  { %2368 = dma.done.wait [#allocation3], 64 }
  0x17   :  { %2369 = vsyncadd [#allocation3], 4294967232 }
  0x18   :  { %18 = sfence }
  0x19   :  { %19 = vsyncpa [#allocation7], 0 }
  0x1a   :  { %21 = vsyncpa [#allocation7 + $0x1], 0  ;;  %s2448_s1 = smov 0   ;;  %s2450_s24 = smov 0  }
  0x1b   :  { %s2452_s25 = smov 0   ;;  %s2454_s26 = smov 0  }
  0x1c LB: > { %s2469_s27 = sadd.s32 4294967295, %s2388_s26   ;;  %s2056_s28 = sadd.s32 4294967294, %s2388_s26   ;;  %s2388_s26 = sphi %s2454_s26, %s3132_s26   ;;  %s2384_s25 = sphi %s2452_s25, %s3131_s25   ;;  %s2380_s24 = sphi %s2450_s24, %s3130_s24   ;;  %s2376_s1 = sphi %s2448_s1, %s3129_s1  }
  0x1d   : > { %s2473_s29 = sadd.s32 1, %s2388_s26   ;;  %s81_s30 = sadd.s32 1, %s2384_s25 }
  0x1e   : > { %s78_s5 = ssub.s32 %s2388_s26, %s2473_s29  ;;  %p91_p10 = scmp.ne.s32.totalorder %s2384_s25, %s2380_s24 }
  0x1f   : > { %p79_p11 = scmp.eq.s32.totalorder %s78_s5, 0  ;;  %p92_p12 = scmp.eq.s32.totalorder %s2469_s27, 1 }
  0x20   : > { %p97_p13 = scmp.ne.s32.totalorder %s2380_s24, %s2376_s1  ;;  %p98_p0 = scmp.eq.s32.totalorder %s2056_s28, 1 }
  0x21   : > { %s2484_s6 = scalar_select %p79_p11, %s2384_s25, %s81_s30  }
  0x22   : > { %p2486_p1 = por %p92_p12, %p91_p10  ;;  %p2490_p2 = por %p98_p0, %p97_p13 }
  0x23   : > { %p2059_p3 = scmp.ge.s32.totalorder %s2388_s26, 1  ;;  %p127_p4 = scmp.lt.s32.totalorder %s2388_s26, 3 }
  0x25   : > { %p128_p5 = pnand %p2059_p3, %p127_p4 }
  0x26   : > { %p149_p6 = scmp.lt.s32.totalorder (!%p128_p5), %s2469_s27, 1  ;;  %s2394_s14 = smov (!%p128_p5), 3  }
  0x27   : > { %131 = sbr.rel (%p128_p5) target bundleno = 1077 (0x435), region = 28  ;;  %s2396_s15 = smov (!%p128_p5), 25  }
  0x28   : > { %s2397_s16 = smov (!%p128_p5), 47   ;;  %s2398_s17 = smov (!%p128_p5), 69  }
  0x29   : > { %s2399_s20 = smov (!%p128_p5), 2   ;;  %s2400_s23 = smov (!%p128_p5), 4  }
  0x2a   : > { %s2401_s30 = smov (!%p128_p5), 6   ;;  %s2402_s12 = smov (!%p128_p5), 1  }
  0x2b   : > { %s2403_s0 = smov (!%p128_p5), 5   ;;  %s2404_s28 = smov (!%p128_p5), 127  }
  0x2c   : > { %v2392_v0 = vmov 0   ;;  %s150_s9 = scalar_select %p149_p6, %s2469_s27, 1  ;;  %vm154_vm0 = vcmask 769024   ;;  %v2393_v3 = vmov 0.0   ;;  %v2395_v5 = vmov 15  }
  0x2d   : > { %2293 = vset.pattern.permute.xlu1 %v2392_v0  ;;  %2292 = vset.pattern.permute.xlu0 %v2392_v0  ;;  %155 = vst.msk [vmem:[#allocation2] sm:$0xff] %vm154_vm0, %v2393_v3  ;;  %156 = vst.msk [vmem:[#allocation2 + $0x8] sm:$0xff] %vm154_vm0, %v2393_v3  ;;  %vm157_vm1 = vcmask 766976   ;;  %v2073_v11 = vld [vmem:[%s3124_s3 + $0x2] ss:$0 sm:$0xff]  ;;  %vm169_vm2 = vcmask 154648  }
  0x2e   : > { %s2145_s10 = sshll.u32 %s150_s9, 6  ;;  %2171 = vmatprep.subr.mxu0 %v2393_v3  ;;  %2178 = vmatprep.subr.mxu1 %v2393_v3  ;;  %158 = vst.msk [vmem:[#allocation2 + $0x10] sm:$0x3f] %vm157_vm1, %v2393_v3  ;;  %v2075_v12 = vld [vmem:[%s3124_s3 + $0x4] ss:$0 sm:$0xff]  ;;  %vm180_vm3 = vcmask 23552  }
  0x2f   : > { %s2501_s13 = scalar_lea.vmem %s3123_s2, %s2145_s10  ;;  %v2077_v13 = vld [vmem:[%s3124_s3 + $0x6] ss:$0 sm:$0xff]  ;;  %v2072_v14 = vld [vmem:[%s3124_s3 + $0x1] ss:$0 sm:$0xff]  ;;  %v2080_v15 = vld [vmem:[%s3124_s3 + $0x9] ss:$0 sm:$0xff] }
  0x30   : > { %v2063_v1 = vld [vmem:[%s2501_s13 + $0x10] sm:$0xff]  ;;  %v159_v2 = vld [vmem:[%s2501_s13] sm:$0xff]  ;;  %v160_v4 = vld [vmem:[%s2501_s13 + $0x8] sm:$0xff]  ;;  %vm191_vm4 = vcmask 179352   ;;  %vm205_vm5 = vcmask 335048   ;;  %vm216_vm6 = vcmask 203952  }
  0x31   : > { %209 = vperm.xlu1 %2293, %v2063_v1   ;;  %173 = vperm.xlu0 %2292, %v159_v2   ;;  %v2064_v6 = vld [vmem:[%s2501_s13 + $0x18] sm:$0xff]  ;;  %v2065_v7 = vld [vmem:[%s2501_s13 + $0x20] sm:$0xff]  ;;  %v2066_v8 = vld [vmem:[%s2501_s13 + $0x28] sm:$0xff]  ;;  %vm227_vm7 = vcmask 359752   ;;  %vm241_vm8 = vcmask 515448   ;;  %vm252_vm9 = vcmask 384352  }
  0x32   : > { %v2067_v9 = vld [vmem:[%s2501_s13 + $0x30] sm:$0xff]  ;;  %v2068_v10 = vld [vmem:[%s2501_s13 + $0x38] sm:$0xff]  ;;  %v2074_v16 = vld [vmem:[%s3124_s3 + $0x3] ss:$0 sm:$0xff]  ;;  %vm263_vm10 = vcmask 540152   ;;  %vm277_vm11 = vcmask 695848  }
  0x33   : > { %v2082_v17 = vld [vmem:[%s3124_s3 + $0xb] ss:$0 sm:$0xff]  ;;  %v2076_v18 = vld [vmem:[%s3124_s3 + $0x5] ss:$0 sm:$0xff]  ;;  %v2084_v19 = vld [vmem:[%s3124_s3 + $0xd] ss:$0 sm:$0xff] }
  0x34   : > { %v2079_v20 = vld [vmem:[%s3124_s3 + $0x8] ss:$0 sm:$0xff]  ;;  %v2087_v21 = vld [vmem:[%s3124_s3 + $0x10] ss:$0 sm:$0xff]  ;;  %v2081_v22 = vld [vmem:[%s3124_s3 + $0xa] ss:$0 sm:$0xff] }
  0x35   : > { %163 = vrot.lane.b32.xlu1 %v159_v2, %s2394_s14  ;;  %177 = vperm.xlu0 %2292, %v160_v4   ;;  %v2089_v23 = vld [vmem:[%s3124_s3 + $0x12] ss:$0 sm:$0xff]  ;;  %v2083_v24 = vld [vmem:[%s3124_s3 + $0xc] ss:$0 sm:$0xff]  ;;  %v2091_v25 = vld [vmem:[%s3124_s3 + $0x14] ss:$0 sm:$0xff] }
  0x36   : > { %2294 = vset.pattern.permute.xlu1 %v2395_v5  ;;  %v2086_v26 = vld [vmem:[%s3124_s3 + $0xf] ss:$0 sm:$0xff]  ;;  %v2094_v27 = vld [vmem:[%s3124_s3 + $0x17] ss:$0 sm:$0xff]  ;;  %v2088_v28 = vld [vmem:[%s3124_s3 + $0x11] ss:$0 sm:$0xff] }
  0x37   : > { %v2096_v29 = vld [vmem:[%s3124_s3 + $0x19] ss:$0 sm:$0xff]  ;;  %v2090_v30 = vld [vmem:[%s3124_s3 + $0x13] ss:$0 sm:$0xff]  ;;  %v2098_v31 = vld [vmem:[%s3124_s3 + $0x1b] ss:$0 sm:$0xff] }
  0x38   : > { %v2093_v32 = vld [vmem:[%s3124_s3 + $0x16] ss:$0 sm:$0xff]  ;;  %v2101_v33 = vld [vmem:[%s3124_s3 + $0x1e] ss:$0 sm:$0xff]  ;;  %v2095_v34 = vld [vmem:[%s3124_s3 + $0x18] ss:$0 sm:$0xff] }
  0x39   : > { %220 = vperm.xlu1 %2294, %v2063_v1   ;;  %199 = vrot.lane.b32.xlu0 %v2063_v1, %s2396_s15  ;;  %v2102_v35 = vld [vmem:[%s3124_s3 + $0x1f] ss:$0 sm:$0xff]  ;;  %v2097_v36 = vld [vmem:[%s3124_s3 + $0x1a] ss:$0 sm:$0xff]  ;;  %v2104_v37 = vld [vmem:[%s3124_s3 + $0x21] ss:$0 sm:$0xff] }
  0x3a   : > { %v2100_v38 = vld [vmem:[%s3124_s3 + $0x1d] ss:$0 sm:$0xff]  ;;  %v2107_v39 = vld [vmem:[%s3124_s3 + $0x24] ss:$0 sm:$0xff]  ;;  %v2103_v40 = vld [vmem:[%s3124_s3 + $0x20] ss:$0 sm:$0xff] }
  0x3b   : > { %v2108_v41 = vld [vmem:[%s3124_s3 + $0x25] ss:$0 sm:$0xff]  ;;  %v2105_v42 = vld [vmem:[%s3124_s3 + $0x22] ss:$0 sm:$0xff]  ;;  %v2109_v43 = vld [vmem:[%s3124_s3 + $0x26] ss:$0 sm:$0xff] }
  0x3c   : > { %v2110_v44 = vld [vmem:[%s3124_s3 + $0x27] ss:$0 sm:$0xff]  ;;  %v2111_v45 = vld [vmem:[%s3124_s3 + $0x28] ss:$0 sm:$0xff]  ;;  %vm288_vm12 = vcmask 564752   ;;  %vm299_vm13 = vcmask 720552  }
  0x3d   : > { %2295 = vset.pattern.permute.xlu1 %v2392_v0  ;;  %213 = vperm.xlu0 %2292, %v2064_v6   ;;  %vm308_vm14 = vcmask 763904   ;;  %s2405_s5 = smov 126   ;;  %s2406_s9 = smov 125   ;;  %vm2410_vm15 = vmmov 0  }
  0x3e   : > { %245 = vperm.xlu1 %2295, %v2065_v7   ;;  %s2407_s10 = smov 124   ;;  %s2408_s11 = smov 123   ;;  %2175 = vmatprep.mubr.msk.f32.mxu0 %vm2410_vm15, %v2393_v3 }
  0x3f   : > { %s2409_s13 = smov 122   ;;  %2182 = vmatprep.mubr.msk.f32.mxu1 %vm2410_vm15, %v2393_v3  ;;  %s2413_s18 = smov 62  }
  0x41   : > { %165 = vrot.lane.b32.xlu0 %v160_v4, %s2394_s14 }
  0x42   : > { %2296 = vset.pattern.permute.xlu1 %v2395_v5 }
  0x43   : > { %188 = vperm.xlu1 %2296, %v160_v4  }
  0x45   : > { %235 = vrot.lane.b32.xlu0 %v2065_v7, %s2397_s16 }
  0x47   : > { %256 = vperm.xlu1 %2296, %v2065_v7  }
  0x49   : > { %249 = vperm.xlu0 %2292, %v2066_v8  }
  0x4b   : > { %2297 = vset.pattern.permute.xlu1 %v2392_v0 }
  0x4c   : > { %281 = vperm.xlu1 %2297, %v2067_v9  }
  0x4d   : > { %2299 = vset.pattern.permute.xlu0 %v2395_v5 }
  0x4e   : > { %184 = vperm.xlu0 %2299, %v159_v2  }
  0x50   : > { %2298 = vset.pattern.permute.xlu1 %v2395_v5 }
  0x51   : > { %224 = vperm.xlu1 %2298, %v2064_v6  }
  0x52   : > { %260 = vperm.xlu0 %2299, %v2066_v8  }
  0x55   : > { %292 = vperm.xlu1 %2298, %v2067_v9  }
  0x56   : > { %237 = vrot.lane.b32.xlu0 %v2066_v8, %s2397_s16  ;;  %s2146_s16 = sshll.u32 %s2469_s27, 8 }
  0x59   : > { %201 = vrot.lane.b32.xlu1 %v2064_v6, %s2396_s15 }
  0x5a   : > { %2300 = vset.pattern.permute.xlu1 %v2392_v0  ;;  %273 = vrot.lane.b32.xlu0 %v2068_v10, %s2398_s17 }
  0x5d   : > { %271 = vrot.lane.b32.xlu1 %v2067_v9, %s2398_s17  ;;  %s2411_s17 = smov 106  }
  0x5e   : > { %353 = vrot.lane.b32.xlu0 %v2073_v11, %s2399_s20 }
  0x61   : > { %285 = vperm.xlu1 %2300, %v2068_v10  }
  0x62   : > { %395 = vrot.lane.b32.xlu0 %v2075_v12, %s2400_s23 }
  0x65   : > { %2301 = vset.pattern.permute.xlu1 %v2395_v5 }
  0x66   : > { %296 = vperm.xlu1 %2301, %v2068_v10   ;;  %437 = vrot.lane.b32.xlu0 %v2077_v13, %s2401_s30 }
  0x6a   : > { %332 = vrot.lane.b32.xlu1 %v2072_v14, %s2402_s12  ;;  %490 = vrot.lane.b32.xlu0 %v2080_v15, %s2399_s20 }
  0x6e   : > { %374 = vrot.lane.b32.xlu1 %v2074_v16, %s2394_s14  ;;  %532 = vrot.lane.b32.xlu0 %v2082_v17, %s2400_s23 }
  0x72   : > { %416 = vrot.lane.b32.xlu1 %v2076_v18, %s2403_s0  ;;  %574 = vrot.lane.b32.xlu0 %v2084_v19, %s2401_s30 }
  0x76   : > { %469 = vrot.lane.b32.xlu1 %v2079_v20, %s2402_s12  ;;  %627 = vrot.lane.b32.xlu0 %v2087_v21, %s2399_s20 }
  0x7a   : > { %511 = vrot.lane.b32.xlu1 %v2081_v22, %s2394_s14  ;;  %669 = vrot.lane.b32.xlu0 %v2089_v23, %s2400_s23 }
  0x7e   : > { %553 = vrot.lane.b32.xlu1 %v2083_v24, %s2403_s0  ;;  %711 = vrot.lane.b32.xlu0 %v2091_v25, %s2401_s30 }
  0x82   : > { %606 = vrot.lane.b32.xlu1 %v2086_v26, %s2402_s12  ;;  %764 = vrot.lane.b32.xlu0 %v2094_v27, %s2399_s20 }
  0x86   : > { %648 = vrot.lane.b32.xlu1 %v2088_v28, %s2394_s14  ;;  %806 = vrot.lane.b32.xlu0 %v2096_v29, %s2400_s23 }
  0x8a   : > { %690 = vrot.lane.b32.xlu1 %v2090_v30, %s2403_s0  ;;  %848 = vrot.lane.b32.xlu0 %v2098_v31, %s2401_s30 }
  0x8e   : > { %743 = vrot.lane.b32.xlu1 %v2093_v32, %s2402_s12  ;;  %901 = vrot.lane.b32.xlu0 %v2101_v33, %s2399_s20 }
  0x92   : > { %785 = vrot.lane.b32.xlu1 %v2095_v34, %s2394_s14  ;;  %922 = vrot.lane.b32.xlu0 %v2102_v35, %s2394_s14 }
  0x96   : > { %827 = vrot.lane.b32.xlu1 %v2097_v36, %s2403_s0  ;;  %964 = vrot.lane.b32.xlu0 %v2104_v37, %s2403_s0 }
  0x9a   : > { %880 = vrot.lane.b32.xlu1 %v2100_v38, %s2402_s12  ;;  %1017 = vrot.lane.b32.xlu0 %v2107_v39, %s2402_s12 }
  0x9e   : > { %943 = vrot.lane.b32.xlu1 %v2103_v40, %s2400_s23  ;;  %1038 = vrot.lane.b32.xlu0 %v2108_v41, %s2399_s20 }
  0xa2   : > { %985 = vrot.lane.b32.xlu1 %v2105_v42, %s2401_s30  ;;  %1059 = vrot.lane.b32.xlu0 %v2109_v43, %s2394_s14 }
  0xa6   : > { %1080 = vrot.lane.b32.xlu1 %v2110_v44, %s2400_s23  ;;  %1101 = vrot.lane.b32.xlu0 %v2111_v45, %s2403_s0 }
  0xac   : > { %v210_v46 = vpop.permute.xlu1 %209  ;;  %v174_v47 = vpop.permute.xlu0 %173 }
  0xb0   : > { %v164_v48 = vpop.permute.xlu1 %163  ;;  %v178_v49 = vpop.permute.xlu0 %177 }
  0xb1   : > { %170 = vst.msk [vmem:[#allocation2 + $0x3] sm:$0xff] %vm169_vm2, %v164_v48  ;;  %v2112_v48 = vld [vmem:[%s3124_s3 + $0x29] ss:$0 sm:$0xff] }
  0xb2   : > { %181 = vst.msk [vmem:[#allocation2 + $0x3] sm:$0xff] %vm180_vm3, %v174_v47 }
  0xb4   : > { %v221_v50 = vpop.permute.xlu1 %220  ;;  %v200_v51 = vpop.permute.xlu0 %199 }
  0xb8   : > { %v214_v52 = vpop.permute.xlu0 %213 }
  0xb9   : > { %v246_v53 = vpop.permute.xlu1 %245 }
  0xbc   : > { %v166_v54 = vpop.permute.xlu0 %165 }
  0xbd   : > { %171 = vst.msk [vmem:[#allocation2 + $0xb] sm:$0xff] %vm169_vm2, %v166_v54 }
  0xbe   : > { %v189_v55 = vpop.permute.xlu1 %188  ;;  %182 = vst.msk [vmem:[#allocation2 + $0xb] sm:$0xff] %vm180_vm3, %v178_v49  ;;  %v2115_v49 = vld [vmem:[%s3124_s3 + $0x2c] ss:$0 sm:$0xff]  ;;  %vm1304_vm3 = vcmask 130048  }
  0xbf   : > { %193 = vst.msk [vmem:[#allocation2 + $0xb] sm:$0xff] %vm191_vm4, %v189_v55 }
  0xc0   : > { %v236_v56 = vpop.permute.xlu0 %235 }
  0xc2   : > { %v257_v57 = vpop.permute.xlu1 %256 }
  0xc4   : > { %v250_v58 = vpop.permute.xlu0 %249 }
  0xc7   : > { %v282_v59 = vpop.permute.xlu1 %281 }
  0xc9   : > { %v185_v60 = vpop.permute.xlu0 %184 }
  0xca   : > { %192 = vst.msk [vmem:[#allocation2 + $0x3] sm:$0xff] %vm191_vm4, %v185_v60 }
  0xcb   : > { %206 = vst.msk [vmem:[#allocation2 + $0x3] sm:$0xff] %vm205_vm5, %v200_v51 }
  0xcc   : > { %217 = vst.msk [vmem:[#allocation2 + $0x3] sm:$0xff] %vm216_vm6, %v210_v46  ;;  %v225_v61 = vpop.permute.xlu1 %224  ;;  %v2114_v46 = vld [vmem:[%s3124_s3 + $0x2b] ss:$0 sm:$0xff] }
  0xcd   : > { %228 = vst.msk [vmem:[#allocation2 + $0x3] sm:$0xff] %vm227_vm7, %v221_v50  ;;  %v261_v62 = vpop.permute.xlu0 %260 }
  0xce   : > { %242 = vst.msk [vmem:[#allocation2 + $0x3] sm:$0xff] %vm241_vm8, %v236_v56 }
  0xcf   : > { %253 = vst.msk [vmem:[#allocation2 + $0x3] sm:$0xff] %vm252_vm9, %v246_v53 }
  0xd0   : > { %v293_v63 = vpop.permute.xlu1 %292  ;;  %264 = vst.msk [vmem:[#allocation2 + $0x3] sm:$0xff] %vm263_vm10, %v257_v57 }
  0xd1   : > { %v238_v0 = vpop.permute.xlu0 %237 }
  0xd4   : > { %v202_v1 = vpop.permute.xlu1 %201 }
  0xd5   : > { %207 = vst.msk [vmem:[#allocation2 + $0xb] sm:$0xff] %vm205_vm5, %v202_v1  ;;  %v274_v4 = vpop.permute.xlu0 %273 }
  0xd6   : > { %218 = vst.msk [vmem:[#allocation2 + $0xb] sm:$0xff] %vm216_vm6, %v214_v52  ;;  %v2116_v52 = vld [vmem:[%s3124_s3 + $0x2d] ss:$0 sm:$0xff] }
  0xd7   : > { %229 = vst.msk [vmem:[#allocation2 + $0xb] sm:$0xff] %vm227_vm7, %v225_v61 }
  0xd8   : > { %243 = vst.msk [vmem:[#allocation2 + $0xb] sm:$0xff] %vm241_vm8, %v238_v0  ;;  %v272_v2 = vpop.permute.xlu1 %271 }
  0xd9   : > { %254 = vst.msk [vmem:[#allocation2 + $0xb] sm:$0xff] %vm252_vm9, %v250_v58  ;;  %v354_v8 = vpop.permute.xlu0 %353 }
  0xda   : > { %278 = vst.msk [vmem:[#allocation2 + $0x3] sm:$0xff] %vm277_vm11, %v272_v2 }
  0xdb   : > { %265 = vst.msk [vmem:[#allocation2 + $0xb] sm:$0xff] %vm263_vm10, %v261_v62 }
  0xdc   : > { %289 = vst.msk [vmem:[#allocation2 + $0x3] sm:$0xff] %vm288_vm12, %v282_v59  ;;  %v286_v5 = vpop.permute.xlu1 %285 }
  0xdd   : > { %279 = vst.msk [vmem:[#allocation2 + $0xb] sm:$0xff] %vm277_vm11, %v274_v4  ;;  %v396_v10 = vpop.permute.xlu0 %395 }
  0xde   : > { %300 = vst.msk [vmem:[#allocation2 + $0x3] sm:$0xff] %vm299_vm13, %v293_v63  ;;  %v2118_v63 = vld [vmem:[%s3124_s3 + $0x2f] ss:$0 sm:$0xff] }
  0xdf   : > { %290 = vst.msk [vmem:[#allocation2 + $0xb] sm:$0xff] %vm288_vm12, %v286_v5  ;;  %v2117_v5 = vld [vmem:[%s3124_s3 + $0x2e] ss:$0 sm:$0xff] }
  0xe1   : > { %v297_v6 = vpop.permute.xlu1 %296  ;;  %v438_v16 = vpop.permute.xlu0 %437 }
  0xe2   : > { %301 = vst.msk [vmem:[#allocation2 + $0xb] sm:$0xff] %vm299_vm13, %v297_v6 }
  0xe5   : > { %v2069_v7 = vld [vmem:[#allocation2 + $0x3] ss:$0 sm:$0xff]  ;;  %v333_v9 = vpop.permute.xlu1 %332  ;;  %v491_v22 = vpop.permute.xlu0 %490 }
  0xe6   : > { %309 = vst.msk [vmem:[#allocation2] sm:$0x7] %vm308_vm14, %v2069_v7 }
  0xe9   : > { %v2070_v11 = vld [vmem:[#allocation2 + $0x12] ss:$0 sm:$0xff]  ;;  %v2670_v12 = vld [vmem:[#allocation2 + $0x8] sm:$0xff]  ;;  %v375_v13 = vpop.permute.xlu1 %374  ;;  %v533_v37 = vpop.permute.xlu0 %532 }
  0xea   : > { %314 = vst.msk [vmem:[#allocation2 + $0x13] sm:$0x7] %vm308_vm14, %v2070_v11  ;;  %v336_v14 = vmul.f32 %v333_v9, %v2670_v12  ;;  %v357_v15 = vmul.f32 %v354_v8, %v2670_v12  ;;  %v378_v17 = vmul.f32 %v375_v13, %v2670_v12  ;;  %v399_v19 = vmul.f32 %v396_v10, %v2670_v12  ;;  %v2679_v20 = vld [vmem:[#allocation2 + $0x9] sm:$0xff] }
  0xeb   : > { %v494_v23 = vmul.f32 %v491_v22, %v2679_v20  ;;  %v441_v26 = vmul.f32 %v438_v16, %v2670_v12  ;;  %v536_v38 = vmul.f32 %v533_v37, %v2679_v20  ;;  %v2739_v54 = vld [vmem:[#allocation2 + $0xa] sm:$0xff] }
  0xec   : > { %341 = vrot.lane.b32.xlu1 %v336_v14, %s2404_s28  ;;  %362 = vrot.lane.b32.xlu0 %v357_v15, %s2405_s5 }
  0xed   : > { %v417_v18 = vpop.permute.xlu1 %416  ;;  %v2685_v25 = vld [vmem:[#allocation2] sm:$0xff]  ;;  %v575_v43 = vpop.permute.xlu0 %574 }
  0xee   : > { %v420_v21 = vmul.f32 %v417_v18, %v2670_v12  ;;  %v356_v27 = vmul.f32 %v354_v8, %v2685_v25  ;;  %v398_v30 = vmul.f32 %v396_v10, %v2685_v25  ;;  %v419_v32 = vmul.f32 %v417_v18, %v2685_v25  ;;  %v2700_v34 = vld [vmem:[#allocation2 + $0x1] sm:$0xff] }
  0xef   : > { %v335_v33 = vmul.f32 %v333_v9, %v2685_v25  ;;  %v493_v35 = vmul.f32 %v491_v22, %v2700_v34  ;;  %v377_v36 = vmul.f32 %v375_v13, %v2685_v25  ;;  %v440_v39 = vmul.f32 %v438_v16, %v2685_v25  ;;  %v2745_v59 = vld [vmem:[#allocation2 + $0x2] sm:$0xff]  ;;  %v2119_v16 = vld [vmem:[%s3124_s3 + $0x30] ss:$0 sm:$0xff] }
  0xf0   : > { %383 = vrot.lane.b32.xlu1 %v378_v17, %s2406_s9  ;;  %404 = vrot.lane.b32.xlu0 %v399_v19, %s2407_s10  ;;  %v535_v40 = vmul.f32 %v533_v37, %v2700_v34  ;;  %v578_v53 = vmul.f32 %v575_v43, %v2679_v20  ;;  %v577_v57 = vmul.f32 %v575_v43, %v2700_v34  ;;  %v2777_v17 = vld [vmem:[#allocation2 + $0x3] sm:$0xff] }
  0xf1   : > { %v470_v24 = vpop.permute.xlu1 %469  ;;  %v628_v47 = vpop.permute.xlu0 %627 }
  0xf2   : > { %v473_v28 = vmul.f32 %v470_v24, %v2679_v20  ;;  %v472_v41 = vmul.f32 %v470_v24, %v2700_v34  ;;  %v631_v55 = vmul.f32 %v628_v47, %v2739_v54  ;;  %v630_v60 = vmul.f32 %v628_v47, %v2745_v59 }
  0xf4   : > { %425 = vrot.lane.b32.xlu1 %v420_v21, %s2408_s11  ;;  %499 = vrot.lane.b32.xlu0 %v494_v23, %s2405_s5 }
  0xf5   : > { %v512_v29 = vpop.permute.xlu1 %511  ;;  %v670_v51 = vpop.permute.xlu0 %669 }
  0xf6   : > { %v515_v31 = vmul.f32 %v512_v29, %v2679_v20  ;;  %v514_v45 = vmul.f32 %v512_v29, %v2700_v34  ;;  %v673_v2 = vmul.f32 %v670_v51, %v2739_v54  ;;  %v672_v7 = vmul.f32 %v670_v51, %v2745_v59  ;;  %v2829_v51 = vld [vmem:[#allocation2 + $0xc] sm:$0xff] }
  0xf8   : > { %446 = vrot.lane.b32.xlu1 %v441_v26, %s2409_s13  ;;  %360 = vrot.lane.b32.xlu0 %v356_v27, %s2405_s5  ;;  %v2788_v27 = vld [vmem:[#allocation2 + $0xb] sm:$0xff] }
  0xf9   : > { %v554_v42 = vpop.permute.xlu1 %553  ;;  %v712_v56 = vpop.permute.xlu0 %711 }
  0xfa   : > { %v556_v44 = vmul.f32 %v554_v42, %v2700_v34  ;;  %v557_v50 = vmul.f32 %v554_v42, %v2679_v20  ;;  %v714_v14 = vmul.f32 %v712_v56, %v2745_v59  ;;  %v715_v24 = vmul.f32 %v712_v56, %v2739_v54  ;;  %v2811_v42 = vld [vmem:[#allocation2 + $0x4] sm:$0xff] }
  0xfc   : > { %478 = vrot.lane.b32.xlu1 %v473_v28, %s2404_s28  ;;  %402 = vrot.lane.b32.xlu0 %v398_v30, %s2407_s10 }
  0xfd   : > { %v607_v58 = vpop.permute.xlu1 %606  ;;  %v765_v62 = vpop.permute.xlu0 %764 }
  0xfe   : > { %v610_v61 = vmul.f32 %v607_v58, %v2739_v54  ;;  %v609_v0 = vmul.f32 %v607_v58, %v2745_v59  ;;  %v767_v23 = vmul.f32 %v765_v62, %v2777_v17 }
 0x100   : > { %520 = vrot.lane.b32.xlu1 %v515_v31, %s2406_s9  ;;  %423 = vrot.lane.b32.xlu0 %v419_v32, %s2408_s11 }
 0x101   : > { %v649_v1 = vpop.permute.xlu1 %648  ;;  %v807_v4 = vpop.permute.xlu0 %806 }
 0x102   : > { %v652_v8 = vmul.f32 %v649_v1, %v2739_v54  ;;  %v651_v11 = vmul.f32 %v649_v1, %v2745_v59  ;;  %v809_v32 = vmul.f32 %v807_v4, %v2777_v17 }
 0x104   : > { %339 = vrot.lane.b32.xlu1 %v335_v33, %s2404_s28  ;;  %497 = vrot.lane.b32.xlu0 %v493_v35, %s2405_s5  ;;  %v768_v33 = vmul.f32 %v765_v62, %v2788_v27 }
 0x105   : > { %v691_v6 = vpop.permute.xlu1 %690  ;;  %v849_v9 = vpop.permute.xlu0 %848 }
 0x106   : > { %v693_v10 = vmul.f32 %v691_v6, %v2745_v59  ;;  %v694_v21 = vmul.f32 %v691_v6, %v2739_v54 }
 0x108   : > { %381 = vrot.lane.b32.xlu1 %v377_v36, %s2406_s9  ;;  %541 = vrot.lane.b32.xlu0 %v536_v38, %s2407_s10 }
 0x109   : > { %v744_v13 = vpop.permute.xlu1 %743  ;;  %v902_v15 = vpop.permute.xlu0 %901 }
 0x10a   : > { %v746_v19 = vmul.f32 %v744_v13, %v2777_v17  ;;  %v747_v30 = vmul.f32 %v744_v13, %v2788_v27  ;;  %v904_v47 = vmul.f32 %v902_v15, %v2811_v42  ;;  %v905_v62 = vmul.f32 %v902_v15, %v2829_v51 }
 0x10c   : > { %444 = vrot.lane.b32.xlu1 %v440_v39, %s2409_s13  ;;  %539 = vrot.lane.b32.xlu0 %v535_v40, %s2407_s10  ;;  %v851_v39 = vmul.f32 %v849_v9, %v2777_v17 }
 0x10d   : > { %v786_v18 = vpop.permute.xlu1 %785  ;;  %v923_v22 = vpop.permute.xlu0 %922 }
 0x10e   : > { %v788_v28 = vmul.f32 %v786_v18, %v2777_v17  ;;  %v789_v37 = vmul.f32 %v786_v18, %v2788_v27 }
 0x110   : > { %476 = vrot.lane.b32.xlu1 %v472_v41, %s2404_s28  ;;  %560 = vrot.lane.b32.xlu0 %v556_v44, %s2408_s11  ;;  %v810_v41 = vmul.f32 %v807_v4, %v2788_v27  ;;  %v926_v4 = vmul.f32 %v923_v22, %v2829_v51 }
 0x111   : > { %v828_v26 = vpop.permute.xlu1 %827  ;;  %v2791_v29 = vpop.permute.xlu0 %964 }
 0x112   : > { %v830_v36 = vmul.f32 %v828_v26, %v2777_v17 }
 0x114   : > { %518 = vrot.lane.b32.xlu1 %v514_v45, %s2406_s9  ;;  %1154 = vrot.lane.b32.xlu0 %v2114_v46, %s2402_s12  ;;  %v831_v45 = vmul.f32 %v828_v26, %v2788_v27 }
 0x115   : > { %v881_v31 = vpop.permute.xlu1 %880  ;;  %v2798_v35 = vpop.permute.xlu0 %1017 }
 0x116   : > { %v883_v44 = vmul.f32 %v881_v31, %v2811_v42  ;;  %v884_v56 = vmul.f32 %v881_v31, %v2829_v51 }
 0x118   : > { %1122 = vrot.lane.b32.xlu1 %v2112_v48, %s2401_s30  ;;  %1175 = vrot.lane.b32.xlu0 %v2115_v49, %s2399_s20  ;;  %v852_v48 = vmul.f32 %v849_v9, %v2788_v27 }
 0x119   : > { %v944_v38 = vpop.permute.xlu1 %943  ;;  %v2807_v40 = vpop.permute.xlu0 %1038 }
 0x11c   : > { %562 = vrot.lane.b32.xlu1 %v557_v50, %s2408_s11  ;;  %1196 = vrot.lane.b32.xlu0 %v2116_v52, %s2394_s14  ;;  %v2071_v50 = vld [vmem:[%s3124_s3] ss:$0 sm:$0xff]  ;;  %v925_v52 = vmul.f32 %v923_v22, %v2811_v42  ;;  %v968_v22 = vmul.f32 %v2791_v29, %v2829_v51  ;;  %s2953_s14 = sshll.u32 %s2469_s27, 7 }
 0x11d   : > { %v986_v43 = vpop.permute.xlu1 %985  ;;  %v2816_v46 = vpop.permute.xlu0 %1059  ;;  %s1280_s20 = sld [smem:[#allocation4 + %s2953_s14]]  ;;  %s1453_s19 = sadd.s32 1, %s2953_s14 }
 0x11e   : > { %v988_v9 = vmul.f32 %v986_v43, %v2811_v42  ;;  %s1454_s21 = sld [smem:[#allocation4 + %s1453_s19]]  ;;  %s1630_s22 = sadd.s32 2, %s2953_s14 }
 0x11f   : > { %s1631_s15 = sld [smem:[#allocation4 + %s1630_s22]] }
 0x120   : > { %583 = vrot.lane.b32.xlu1 %v578_v53, %s2409_s13  ;;  %636 = vrot.lane.b32.xlu0 %v631_v55, %s2405_s5  ;;  %v323_v55 = vmul.f32 %v2071_v50, %v2670_v12  ;;  %v967_v12 = vmul.f32 %v2791_v29, %v2811_v42  ;;  %v2868_v29 = vld [vmem:[#allocation2 + $0xd] sm:$0xff] }
 0x121   : > { %v2822_v49 = vpop.permute.xlu1 %1080  ;;  %v2832_v53 = vpop.permute.xlu0 %1101 }
 0x124   : > { %581 = vrot.lane.b32.xlu1 %v577_v57, %s2409_s13  ;;  %634 = vrot.lane.b32.xlu0 %v630_v60, %s2405_s5  ;;  %v946_v60 = vmul.f32 %v944_v38, %v2811_v42 }
 0x128   : > { %615 = vrot.lane.b32.xlu1 %v610_v61, %s2404_s28  ;;  %1238 = vrot.lane.b32.xlu0 %v2118_v63, %s2403_s0  ;;  %s1281_s0 = sld [smem:[#allocation5 + %s2953_s14]] }
 0x12c   : > { %613 = vrot.lane.b32.xlu1 %v609_v0, %s2404_s28  ;;  %678 = vrot.lane.b32.xlu0 %v673_v2, %s2407_s10 }
 0x130   : > { %1217 = vrot.lane.b32.xlu1 %v2117_v5, %s2400_s23  ;;  %676 = vrot.lane.b32.xlu0 %v672_v7, %s2407_s10 }
 0x134   : > { %657 = vrot.lane.b32.xlu1 %v652_v8, %s2406_s9  ;;  %697 = vrot.lane.b32.xlu0 %v693_v10, %s2408_s11  ;;  %v2078_v8 = vld [vmem:[%s3124_s3 + $0x7] ss:$0 sm:$0xff] }
 0x138   : > { %655 = vrot.lane.b32.xlu1 %v651_v11, %s2406_s9  ;;  %718 = vrot.lane.b32.xlu0 %v714_v14, %s2409_s13  ;;  %v947_v11 = vmul.f32 %v944_v38, %v2829_v51  ;;  %v460_v14 = vmul.f32 %v2078_v8, %v2679_v20  ;;  %v1021_v38 = vmul.f32 %v2798_v35, %v2868_v29 }
 0x13c   : > { %1259 = vrot.lane.b32.xlu1 %v2119_v16, %s2401_s30  ;;  %750 = vrot.lane.b32.xlu0 %v746_v19, %s2404_s28  ;;  %v2854_v16 = vld [vmem:[#allocation2 + $0x5] sm:$0xff]  ;;  %s2412_s30 = smov 84  }
 0x13d   : > { %v1020_v18 = vmul.f32 %v2798_v35, %v2854_v16  ;;  %v1041_v20 = vmul.f32 %v2807_v40, %v2854_v16  ;;  %v1104_v35 = vmul.f32 %v2832_v53, %v2854_v16 }
 0x140   : > { %699 = vrot.lane.b32.xlu1 %v694_v21, %s2408_s11  ;;  %771 = vrot.lane.b32.xlu0 %v767_v23, %s2405_s5 }
 0x144   : > { %720 = vrot.lane.b32.xlu1 %v715_v24, %s2409_s13  ;;  %792 = vrot.lane.b32.xlu0 %v788_v28, %s2406_s9 }
 0x148   : > { %752 = vrot.lane.b32.xlu1 %v747_v30, %s2404_s28  ;;  %813 = vrot.lane.b32.xlu0 %v809_v32, %s2407_s10  ;;  %v989_v30 = vmul.f32 %v986_v43, %v2829_v51  ;;  %v1083_v43 = vmul.f32 %v2822_v49, %v2854_v16 }
 0x14c   : > { %773 = vrot.lane.b32.xlu1 %v768_v33, %s2405_s5  ;;  %834 = vrot.lane.b32.xlu0 %v830_v36, %s2408_s11  ;;  %v1062_v33 = vmul.f32 %v2816_v46, %v2854_v16 }
 0x150   : > { %794 = vrot.lane.b32.xlu1 %v789_v37, %s2406_s9  ;;  %855 = vrot.lane.b32.xlu0 %v851_v39, %s2409_s13  ;;  %v322_v37 = vmul.f32 %v2071_v50, %v2685_v25 }
 0x154   : > { %815 = vrot.lane.b32.xlu1 %v810_v41, %s2407_s10  ;;  %887 = vrot.lane.b32.xlu0 %v883_v44, %s2404_s28 }
 0x158   : > { %836 = vrot.lane.b32.xlu1 %v831_v45, %s2408_s11  ;;  %908 = vrot.lane.b32.xlu0 %v904_v47, %s2405_s5  ;;  %v1042_v47 = vmul.f32 %v2807_v40, %v2868_v29  ;;  %v459_v40 = vmul.f32 %v2078_v8, %v2700_v34 }
 0x15c   : > { %857 = vrot.lane.b32.xlu1 %v852_v48, %s2409_s13  ;;  %929 = vrot.lane.b32.xlu0 %v925_v52, %s2406_s9 }
 0x15e   : > { %v342_v57 = vpop.permute.xlu1 %341  ;;  %v363_v61 = vpop.permute.xlu0 %362 }
 0x15f   : > { %v346_v58 = vadd.f32 %v342_v57, %v323_v55  ;;  %v1063_v55 = vmul.f32 %v2816_v46, %v2868_v29 }
 0x160   : > { %889 = vrot.lane.b32.xlu1 %v884_v56, %s2404_s28  ;;  %950 = vrot.lane.b32.xlu0 %v946_v60, %s2407_s10 }
 0x161   : > { %v367_v63 = vadd.f32 %v363_v61, %v346_v58 }
 0x162   : > { %v384_v0 = vpop.permute.xlu1 %383  ;;  %v405_v2 = vpop.permute.xlu0 %404 }
 0x163   : > { %v388_v1 = vadd.f32 %v384_v0, %v367_v63 }
 0x164   : > { %910 = vrot.lane.b32.xlu1 %v905_v62, %s2405_s5  ;;  %971 = vrot.lane.b32.xlu0 %v967_v12, %s2408_s11  ;;  %v1084_v62 = vmul.f32 %v2822_v49, %v2868_v29  ;;  %v1105_v12 = vmul.f32 %v2832_v53, %v2868_v29  ;;  %v2902_v53 = vld [vmem:[#allocation2 + $0xe] sm:$0xff] }
 0x165   : > { %v409_v5 = vadd.f32 %v405_v2, %v388_v1 }
 0x166   : > { %v426_v6 = vpop.permute.xlu1 %425  ;;  %v500_v10 = vpop.permute.xlu0 %499 }
 0x167   : > { %v430_v7 = vadd.f32 %v426_v6, %v409_v5 }
 0x168   : > { %931 = vrot.lane.b32.xlu1 %v926_v4, %s2406_s9  ;;  %992 = vrot.lane.b32.xlu0 %v988_v9, %s2409_s13 }
 0x16a   : > { %v447_v13 = vpop.permute.xlu1 %446  ;;  %v361_v21 = vpop.permute.xlu0 %360 }
 0x16b   : > { %v451_v15 = vadd.f32 %v447_v13, %v430_v7 }
 0x16c   : > { %952 = vrot.lane.b32.xlu1 %v947_v11, %s2407_s10  ;;  %1024 = vrot.lane.b32.xlu0 %v1020_v18, %s2404_s28  ;;  %v2900_v11 = vld [vmem:[#allocation2 + $0x6] sm:$0xff] }
 0x16d   : > { %v462_v19 = vadd.f32 %v460_v14, %v451_v15 }
 0x16e   : > { %v479_v23 = vpop.permute.xlu1 %478  ;;  %v403_v28 = vpop.permute.xlu0 %402 }
 0x16f   : > { %v483_v24 = vadd.f32 %v479_v23, %v462_v19  ;;  %v2085_v19 = vld [vmem:[%s3124_s3 + $0xe] ss:$0 sm:$0xff] }
 0x170   : > { %973 = vrot.lane.b32.xlu1 %v968_v22, %s2408_s11  ;;  %1045 = vrot.lane.b32.xlu0 %v1041_v20, %s2405_s5 }
 0x171   : > { %v504_v26 = vadd.f32 %v500_v10, %v483_v24 }
 0x172   : > { %v521_v31 = vpop.permute.xlu1 %520  ;;  %v424_v36 = vpop.permute.xlu0 %423 }
 0x173   : > { %v525_v32 = vadd.f32 %v521_v31, %v504_v26  ;;  %v597_v26 = vmul.f32 %v2085_v19, %v2739_v54 }
 0x174   : > { %994 = vrot.lane.b32.xlu1 %v989_v30, %s2409_s13  ;;  %1066 = vrot.lane.b32.xlu0 %v1062_v33, %s2406_s9 }
 0x176   : > { %v340_v39 = vpop.permute.xlu1 %339  ;;  %v498_v45 = vpop.permute.xlu0 %497 }
 0x177   : > { %v345_v41 = vadd.f32 %v340_v39, %v322_v37  ;;  %v596_v37 = vmul.f32 %v2085_v19, %v2745_v59 }
 0x178   : > { %1026 = vrot.lane.b32.xlu1 %v1021_v38, %s2404_s28  ;;  %1087 = vrot.lane.b32.xlu0 %v1083_v43, %s2407_s10 }
 0x179   : > { %v366_v44 = vadd.f32 %v361_v21, %v345_v41 }
 0x17a   : > { %v382_v48 = vpop.permute.xlu1 %381  ;;  %v542_v52 = vpop.permute.xlu0 %541 }
 0x17b   : > { %v387_v25 = vadd.f32 %v382_v48, %v366_v44  ;;  %v546_v56 = vadd.f32 %v542_v52, %v525_v32 }
 0x17c   : > { %1047 = vrot.lane.b32.xlu1 %v1042_v47, %s2405_s5  ;;  %1108 = vrot.lane.b32.xlu0 %v1104_v35, %s2408_s11 }
 0x17d   : > { %v408_v50 = vadd.f32 %v403_v28, %v387_v25 }
 0x17e   : > { %v445_v57 = vpop.permute.xlu1 %444  ;;  %v540_v61 = vpop.permute.xlu0 %539 }
 0x17f   : > { %v429_v58 = vadd.f32 %v424_v36, %v408_v50 }
 0x180   : > { %1068 = vrot.lane.b32.xlu1 %v1063_v55, %s2406_s9 }
 0x181   : > { %v450_v60 = vadd.f32 %v445_v57, %v429_v58 }
 0x182   : > { %v477_v63 = vpop.permute.xlu1 %476  ;;  %v561_v46 = vpop.permute.xlu0 %560 }
 0x183   : > { %v461_v0 = vadd.f32 %v459_v40, %v450_v60 }
 0x184   : > { %1089 = vrot.lane.b32.xlu1 %v1084_v62, %s2407_s10 }
 0x185   : > { %v482_v1 = vadd.f32 %v477_v63, %v461_v0 }
 0x186   : > { %v519_v2 = vpop.permute.xlu1 %518  ;;  %v1155_v34 = vpop.permute.xlu0 %1154 }
 0x187   : > { %v503_v4 = vadd.f32 %v498_v45, %v482_v1  ;;  %v1157_v14 = vmul.f32 %v1155_v34, %v2900_v11  ;;  %v1158_v15 = vmul.f32 %v1155_v34, %v2902_v53  ;;  %v2092_v1 = vld [vmem:[%s3124_s3 + $0x15] ss:$0 sm:$0xff] }
 0x188   : > { %1110 = vrot.lane.b32.xlu1 %v1105_v12, %s2408_s11 }
 0x189   : > { %v524_v5 = vadd.f32 %v519_v2, %v503_v4 }
 0x18a   : > { %v1123_v6 = vpop.permute.xlu1 %1122  ;;  %v1176_v9 = vpop.permute.xlu0 %1175 }
 0x18b   : > { %v545_v7 = vadd.f32 %v540_v61, %v524_v5  ;;  %v1125_v8 = vmul.f32 %v1123_v6, %v2854_v16  ;;  %v1126_v49 = vmul.f32 %v1123_v6, %v2868_v29  ;;  %v1178_v23 = vmul.f32 %v1176_v9, %v2900_v11 }
 0x18c   : > { %v1179_v24 = vmul.f32 %v1176_v9, %v2902_v53  ;;  %v733_v5 = vmul.f32 %v2092_v1, %v2777_v17 }
 0x18d   : > { %1131 = vrot.lane.b32.xlu1 %v1126_v49, %s2409_s13  ;;  %1129 = vrot.lane.b32.xlu0 %v1125_v8, %s2409_s13  ;;  %v566_v10 = vadd.f32 %v561_v46, %v545_v7 }
 0x18e   : > { %v563_v13 = vpop.permute.xlu1 %562  ;;  %v1197_v21 = vpop.permute.xlu0 %1196 }
 0x18f   : > { %v567_v18 = vadd.f32 %v563_v13, %v546_v56  ;;  %v1199_v32 = vmul.f32 %v1197_v21, %v2900_v11  ;;  %v1200_v33 = vmul.f32 %v1197_v21, %v2902_v53 }
 0x191   : > { %1163 = vrot.lane.b32.xlu1 %v1158_v15, %s2404_s28  ;;  %1161 = vrot.lane.b32.xlu0 %v1157_v14, %s2404_s28  ;;  %v734_v15 = vmul.f32 %v2092_v1, %v2788_v27  ;;  %s1805_s28 = sadd.s32 3, %s2953_s14 }
 0x192   : > { %v584_v22 = vpop.permute.xlu1 %583  ;;  %v637_v28 = vpop.permute.xlu0 %636 }
 0x193   : > { %v588_v20 = vadd.f32 %v584_v22, %v567_v18 }
 0x195   : > { %1184 = vrot.lane.b32.xlu1 %v1179_v24, %s2405_s5  ;;  %1182 = vrot.lane.b32.xlu0 %v1178_v23, %s2405_s5  ;;  %v599_v30 = vadd.f32 %v597_v26, %v588_v20  ;;  %s1806_s5 = sld [smem:[#allocation4 + %s1805_s28]] }
 0x196   : > { %v582_v31 = vpop.permute.xlu1 %581  ;;  %v635_v38 = vpop.permute.xlu0 %634 }
 0x197   : > { %v587_v36 = vadd.f32 %v582_v31, %v566_v10 }
 0x199   : > { %1205 = vrot.lane.b32.xlu1 %v1200_v33, %s2406_s9  ;;  %1203 = vrot.lane.b32.xlu0 %v1199_v32, %s2406_s9  ;;  %v598_v54 = vadd.f32 %v596_v37, %v587_v36  ;;  %s1455_s9 = sld [smem:[#allocation5 + %s1453_s19]]  ;;  %s2415_s19 = smov [#allocation6]  }
 0x19a   : > { %v616_v39 = vpop.permute.xlu1 %615  ;;  %v1239_v43 = vpop.permute.xlu0 %1238 }
 0x19b   : > { %v620_v41 = vadd.f32 %v616_v39, %v599_v30  ;;  %v1241_v56 = vmul.f32 %v1239_v43, %v2900_v11  ;;  %v1242_v57 = vmul.f32 %v1239_v43, %v2902_v53  ;;  %v2099_v30 = vld [vmem:[%s3124_s3 + $0x1c] ss:$0 sm:$0xff] }
 0x19c   : > { %v870_v27 = vmul.f32 %v2099_v30, %v2811_v42 }
 0x19d   : > { %v641_v44 = vadd.f32 %v637_v28, %v620_v41 }
 0x19e   : > { %v614_v45 = vpop.permute.xlu1 %613  ;;  %v679_v48 = vpop.permute.xlu0 %678 }
 0x19f   : > { %v619_v47 = vadd.f32 %v614_v45, %v598_v54 }
 0x1a1   : > { %v640_v25 = vadd.f32 %v635_v38, %v619_v47 }
 0x1a2   : > { %v1218_v35 = vpop.permute.xlu1 %1217  ;;  %v677_v59 = vpop.permute.xlu0 %676 }
 0x1a3   : > { %v1220_v50 = vmul.f32 %v1218_v35, %v2900_v11  ;;  %v1221_v52 = vmul.f32 %v1218_v35, %v2902_v53  ;;  %v871_v35 = vmul.f32 %v2099_v30, %v2829_v51 }
 0x1a5   : > { %1226 = vrot.lane.b32.xlu1 %v1221_v52, %s2407_s10  ;;  %1224 = vrot.lane.b32.xlu0 %v1220_v50, %s2407_s10  ;;  %s1632_s10 = sld [smem:[#allocation5 + %s1630_s22]] }
 0x1a6   : > { %v658_v55 = vpop.permute.xlu1 %657  ;;  %v698_v58 = vpop.permute.xlu0 %697 }
 0x1a7   : > { %v662_v63 = vadd.f32 %v658_v55, %v641_v44 }
 0x1a9   : > { %1247 = vrot.lane.b32.xlu1 %v1242_v57, %s2408_s11  ;;  %1245 = vrot.lane.b32.xlu0 %v1241_v56, %s2408_s11  ;;  %v683_v8 = vadd.f32 %v679_v48, %v662_v63  ;;  %s1807_s11 = sld [smem:[#allocation5 + %s1805_s28]] }
 0x1aa   : > { %v656_v40 = vpop.permute.xlu1 %655  ;;  %v719_v62 = vpop.permute.xlu0 %718 }
 0x1ab   : > { %v661_v60 = vadd.f32 %v656_v40, %v640_v25 }
 0x1ad   : > { %v682_v61 = vadd.f32 %v677_v59, %v661_v60 }
 0x1ae   : > { %v1260_v0 = vpop.permute.xlu1 %1259  ;;  %v751_v34 = vpop.permute.xlu0 %750 }
 0x1af   : > { %v703_v46 = vadd.f32 %v698_v58, %v682_v61  ;;  %v1262_v12 = vmul.f32 %v1260_v0, %v2900_v11  ;;  %v1263_v2 = vmul.f32 %v1260_v0, %v2902_v53 }
 0x1b1   : > { %v724_v4 = vadd.f32 %v719_v62, %v703_v46  ;;  %1268 = vrot.lane.b32.xlu1 %v1263_v2, %s2409_s13  ;;  %1266 = vrot.lane.b32.xlu0 %v1262_v12, %s2409_s13  ;;  %s146_s13 = sand.u32 1, %s2380_s24  }
 0x1b2   : > { %v700_v6 = vpop.permute.xlu1 %699  ;;  %v772_v9 = vpop.permute.xlu0 %771  ;;  %s2060_s14 = sshll.u32 %s146_s13, 4 }
 0x1b3   : > { %v735_v7 = vadd.f32 %v733_v5, %v724_v4  ;;  %v704_v49 = vadd.f32 %v700_v6, %v683_v8 }
 0x1b5   : > { %v756_v10 = vadd.f32 %v751_v34, %v735_v7 }
 0x1b6   : > { %v721_v13 = vpop.permute.xlu1 %720  ;;  %v793_v18 = vpop.permute.xlu0 %792 }
 0x1b7   : > { %v725_v14 = vadd.f32 %v721_v13, %v704_v49  ;;  %v777_v21 = vadd.f32 %v772_v9, %v756_v10 }
 0x1b9   : > { %v736_v19 = vadd.f32 %v734_v15, %v725_v14  ;;  %v798_v23 = vadd.f32 %v793_v18, %v777_v21  ;;  %v2106_v15 = vld [vmem:[%s3124_s3 + $0x23] ss:$0 sm:$0xff] }
 0x1ba   : > { %v753_v22 = vpop.permute.xlu1 %752  ;;  %v814_v17 = vpop.permute.xlu0 %813 }
 0x1bb   : > { %v819_v26 = vadd.f32 %v814_v17, %v798_v23  ;;  %v757_v32 = vadd.f32 %v753_v22, %v736_v19  ;;  %v1007_v22 = vmul.f32 %v2106_v15, %v2854_v16  ;;  %v1008_v17 = vmul.f32 %v2106_v15, %v2868_v29 }
 0x1bc   : > { %v1293_v15 = vstv %s1281_s0 }
 0x1be   : > { %v774_v24 = vpop.permute.xlu1 %773  ;;  %v835_v20 = vpop.permute.xlu0 %834 }
 0x1bf   : > { %v840_v31 = vadd.f32 %v835_v20, %v819_v26  ;;  %v778_v38 = vadd.f32 %v774_v24, %v757_v32 }
 0x1c2   : > { %v795_v28 = vpop.permute.xlu1 %794  ;;  %v856_v33 = vpop.permute.xlu0 %855 }
 0x1c3   : > { %v861_v36 = vadd.f32 %v856_v33, %v840_v31  ;;  %v799_v39 = vadd.f32 %v795_v28, %v778_v38  ;;  %v1274_v31 = vlaneseq }
 0x1c5   : > { %v872_v54 = vadd.f32 %v870_v27, %v861_v36 }
 0x1c6   : > { %v816_v37 = vpop.permute.xlu1 %815  ;;  %v888_v41 = vpop.permute.xlu0 %887 }
 0x1c7   : > { %v820_v44 = vadd.f32 %v816_v37, %v799_v39  ;;  %v893_v2 = vadd.f32 %v888_v41, %v872_v54  ;;  %v2955_v54 = vshrl.u32 %v1274_v31, 7 }
 0x1ca   : > { %v837_v43 = vpop.permute.xlu1 %836  ;;  %v909_v47 = vpop.permute.xlu0 %908 }
 0x1cb   : > { %v841_v45 = vadd.f32 %v837_v43, %v820_v44  ;;  %v914_v5 = vadd.f32 %v909_v47, %v893_v2  ;;  %v2113_v47 = vld [vmem:[%s3124_s3 + $0x2a] ss:$0 sm:$0xff] }
 0x1ce   : > { %v858_v48 = vpop.permute.xlu1 %857  ;;  %v930_v50 = vpop.permute.xlu0 %929 }
 0x1cf   : > { %v862_v25 = vadd.f32 %v858_v48, %v841_v45  ;;  %v935_v7 = vadd.f32 %v930_v50, %v914_v5  ;;  %v1282_v45 = vmul.u32 4, %v2955_v54  ;;  %v1144_v50 = vmul.f32 %v2113_v47, %v2900_v11 }
 0x1d1   : > { %v873_v52 = vadd.f32 %v871_v35, %v862_v25  ;;  %v1145_v35 = vmul.f32 %v2113_v47, %v2902_v53 }
 0x1d2   : > { %v890_v59 = vpop.permute.xlu1 %889  ;;  %v951_v55 = vpop.permute.xlu0 %950 }
 0x1d3   : > { %v894_v4 = vadd.f32 %v890_v59, %v873_v52  ;;  %v956_v49 = vadd.f32 %v951_v55, %v935_v7  ;;  %v2964_v52 = vadd.s32 2, %v1282_v45 }
 0x1d6   : > { %v911_v56 = vpop.permute.xlu1 %910  ;;  %v972_v58 = vpop.permute.xlu0 %971 }
 0x1d7   : > { %v915_v34 = vadd.f32 %v911_v56, %v894_v4  ;;  %v977_v13 = vadd.f32 %v972_v58, %v956_v49  ;;  %v1284_v56 = vstv %s1280_s20  ;;  %s148_s20 = scalar_lea.vmem [#allocation6], %s2060_s14 }
 0x1d8   : > { %s1994_s12 = sshll.u32 %s148_s20, 4  ;;  %s3073_s12 = int_to_ptr.vmem [resolvable:$true] %s1994_s12 }
 0x1d9   : > { %s2326_s27 = scalar_lea.vmem %s3073_s12, 256 }
 0x1da   : > { %v932_v57 = vpop.permute.xlu1 %931  ;;  %v993_v40 = vpop.permute.xlu0 %992  ;;  %p2327_p7 = scmp.ne.s32.totalorder %s3073_s12, %s2326_s27 }
 0x1db   : > { %v936_v8 = vadd.f32 %v932_v57, %v915_v34  ;;  %v998_v19 = vadd.f32 %v993_v40, %v977_v13 }
 0x1dc   : > { %p2328_p8 = pnand %p2327_p7, %p2486_p1 }
 0x1dd   : > { %v1009_v20 = vadd.f32 %v1007_v22, %v998_v19  ;;  %v1456_v22 = vstv %s1454_s21  ;;  %s2330_s21 = sshll.u32 %s2415_s19, 4  ;;  %s2331_s21 = int_to_ptr.vmem [resolvable:$false] %s2330_s21 }
 0x1de   : > { %v953_v42 = vpop.permute.xlu1 %952  ;;  %v1025_v62 = vpop.permute.xlu0 %1024  ;;  %p2329_p9 = pneg %p2328_p8  ;;  %s2332_s22 = scalar_lea.vmem %s2331_s21, 512 }
 0x1df   : > { %v957_v9 = vadd.f32 %v953_v42, %v936_v8  ;;  %v1030_v28 = vadd.f32 %v1025_v62, %v1009_v20  ;;  %v1285_v42 = vsub.s32 %v2964_v52, %v1284_v56  ;;  %p2333_p10 = scmp.lt.s32.totalorder %s3073_s12, %s2331_s21  ;;  %p2334_p11 = scmp.lt.s32.totalorder %s2332_s22, %s2326_s27 }
 0x1e1   : > { %v1287_v53 = vadd.s32 16, %v1285_v42  ;;  %p2335_p12 = por %p2334_p11, %p2333_p10 }
 0x1e2   : > { %v974_v60 = vpop.permute.xlu1 %973  ;;  %v1046_v0 = vpop.permute.xlu0 %1045 }
 0x1e3   : > { %v978_v14 = vadd.f32 %v974_v60, %v957_v9  ;;  %v1051_v36 = vadd.f32 %v1046_v0, %v1030_v28  ;;  %p2336_p13 = pnand %p2335_p12, %p2329_p9 }
 0x1e6   : > { %v995_v61 = vpop.permute.xlu1 %994  ;;  %v1067_v12 = vpop.permute.xlu0 %1066 }
 0x1e7   : > { %v999_v21 = vadd.f32 %v995_v61, %v978_v14  ;;  %v1072_v27 = vadd.f32 %v1067_v12, %v1051_v36  ;;  %v2980_v14 = vadd.s32 8, %v2955_v54 }
 0x1e9   : > { %v1010_v26 = vadd.f32 %v1008_v17, %v999_v21  ;;  %v2414_v21 = vmov 1.0   ;;  %v1457_v17 = vsub.s32 %v2964_v52, %v1456_v22 }
 0x1ea   : > { %v1027_v63 = vpop.permute.xlu1 %1026  ;;  %v1088_v6 = vpop.permute.xlu0 %1087 }
 0x1eb   : > { %v1031_v30 = vadd.f32 %v1027_v63, %v1010_v26  ;;  %v1093_v16 = vadd.f32 %v1088_v6, %v1072_v27  ;;  %v1808_v26 = vstv %s1806_s5 }
 0x1ee   : > { %v1048_v1 = vpop.permute.xlu1 %1047  ;;  %v1109_v18 = vpop.permute.xlu0 %1108 }
 0x1ef   : > { %v1052_v37 = vadd.f32 %v1048_v1, %v1031_v30  ;;  %v1114_v43 = vadd.f32 %v1109_v18, %v1093_v16  ;;  %v2967_v1 = vand.u32 127, %v1274_v31  ;;  %v1809_v30 = vsub.s32 %v2964_v52, %v1808_v26 }
 0x1f1   : > { %vm1286_vm0 = vcmp.eq.s32.totalorder %v2967_v1, %v1285_v42  ;;  %vm1288_vm1 = vcmp.eq.s32.totalorder %v2967_v1, %v1287_v53  ;;  %v1291_v9 = vmul.u32 4, %v2967_v1  ;;  %vm1458_vm10 = vcmp.eq.s32.totalorder %v2967_v1, %v1457_v17 }
 0x1f2   : > { %v1069_v46 = vpop.permute.xlu1 %1068  ;;  %vm1289_vm2 = vmor %vm1286_vm0, %vm1288_vm1  ;;  %v1811_v31 = vadd.s32 16, %v1809_v30  ;;  %vm1810_vm1 = vcmp.eq.s32.totalorder %v2967_v1, %v1809_v30 }
 0x1f3   : > { %v1073_v38 = vadd.f32 %v1069_v46, %v1052_v37  ;;  %v2975_v13 = vadd.s32 2, %v1291_v9 }
 0x1f5   : > { %v1294_v18 = vsub.s32 %v2975_v13, %v1293_v15 }
 0x1f6   : > { %v1090_v51 = vpop.permute.xlu1 %1089 }
 0x1f7   : > { %v1094_v29 = vadd.f32 %v1090_v51, %v1073_v38  ;;  %vm1296_vm4 = vcmp.eq.s32.totalorder %v2980_v14, %v1294_v18  ;;  %v1297_v19 = vadd.s32 16, %v1294_v18  ;;  %vm1295_vm7 = vcmp.eq.s32.totalorder %v2955_v54, %v1294_v18 }
 0x1f9   : > { %vm1299_vm5 = vcmp.eq.s32.totalorder %v2980_v14, %v1297_v19  ;;  %vm1298_vm8 = vcmp.eq.s32.totalorder %v2955_v54, %v1297_v19 }
 0x1fa   : > { %v1111_v10 = vpop.permute.xlu1 %1110  ;;  %vm1301_vm6 = vmor %vm1296_vm4, %vm1299_vm5 }
 0x1fb   : > { %v1115_v44 = vadd.f32 %v1111_v10, %v1094_v29  ;;  %v1290_v10 = vsel %vm1289_vm2, 1.0, %v2393_v3  ;;  %2179 = vmatpush3.msk.msra.mxu1 %vm1301_vm6, %v2414_v21  ;;  %vm1300_vm9 = vmor %vm1295_vm7, %vm1298_vm8  ;;  %vm1812_vm2 = vcmp.eq.s32.totalorder %v2967_v1, %v1811_v31 }
 0x1fc   : > { %2180 = vmatprep.subr.mxu1 %v2393_v3  ;;  %vm1813_vm4 = vmor %vm1810_vm1, %vm1812_vm2 }
 0x1fd   : > { %2181 = vmatpush3.msk.msra.mxu1 %vm1300_vm9, %v2414_v21  ;;  %v1814_v29 = vsel %vm1813_vm4, 1.0, %v2393_v3 }
 0x1fe   : > { %2192 = vmatprep.subr.mxu1 %v2393_v3 }
 0x1ff   : > { %v1132_v23 = vpop.permute.xlu1 %1131  ;;  %v1130_v24 = vpop.permute.xlu0 %1129 }
 0x200   : > { %v1136_v48 = vadd.f32 %v1132_v23, %v1115_v44  ;;  %v1135_v25 = vadd.f32 %v1130_v24, %v1114_v43  ;;  %v1633_v23 = vstv %s1631_s15  ;;  %v1459_v24 = vadd.s32 16, %v1457_v17 }
 0x201   : > { %v1634_v20 = vsub.s32 %v2964_v52, %v1633_v23 }
 0x202   : > { %v1147_v57 = vadd.f32 %v1145_v35, %v1136_v48  ;;  %v1146_v58 = vadd.f32 %v1144_v50, %v1135_v25  ;;  %vm1460_vm11 = vcmp.eq.s32.totalorder %v2967_v1, %v1459_v24  ;;  %v1640_v48 = vstv %s1632_s10 }
 0x203   : > { %v1164_v32 = vpop.permute.xlu1 %1163  ;;  %v1162_v33 = vpop.permute.xlu0 %1161  ;;  %v1636_v28 = vadd.s32 16, %v1634_v20  ;;  %vm1461_vm12 = vmor %vm1458_vm10, %vm1460_vm11  ;;  %vm1635_vm13 = vcmp.eq.s32.totalorder %v2967_v1, %v1634_v20  ;;  %v1641_v25 = vsub.s32 %v2975_v13, %v1640_v48  ;;  %v1815_v35 = vstv %s1807_s11 }
 0x204   : > { %v1168_v61 = vadd.f32 %v1164_v32, %v1147_v57  ;;  %v1167_v62 = vadd.f32 %v1162_v33, %v1146_v58  ;;  %v1462_v36 = vsel %vm1461_vm12, 1.0, %v2393_v3  ;;  %v1816_v52 = vsub.s32 %v2975_v13, %v1815_v35 }
 0x205   : > { %vm1637_vm14 = vcmp.eq.s32.totalorder %v2967_v1, %v1636_v28  ;;  %v1644_v50 = vadd.s32 16, %v1641_v25  ;;  %vm1643_vm11 = vcmp.eq.s32.totalorder %v2980_v14, %v1641_v25 }
 0x206   : > { %vm1638_vm0 = vmor %vm1635_vm13, %vm1637_vm14  ;;  %vm1642_vm13 = vcmp.eq.s32.totalorder %v2955_v54, %v1641_v25  ;;  %vm1818_vm1 = vcmp.eq.s32.totalorder %v2980_v14, %v1816_v52 }
 0x207   : > { %v1185_v39 = vpop.permute.xlu1 %1184  ;;  %v1183_v41 = vpop.permute.xlu0 %1182  ;;  %v1639_v38 = vsel %vm1638_vm0, 1.0, %v2393_v3  ;;  %vm1646_vm12 = vcmp.eq.s32.totalorder %v2980_v14, %v1644_v50  ;;  %vm1645_vm14 = vcmp.eq.s32.totalorder %v2955_v54, %v1644_v50 }
 0x208   : > { %v1189_v63 = vadd.f32 %v1185_v39, %v1168_v61  ;;  %v1188_v0 = vadd.f32 %v1183_v41, %v1167_v62  ;;  %v1463_v41 = vstv %s1455_s9  ;;  %vm1648_vm0 = vmor %vm1643_vm11, %vm1646_vm12 }
 0x209   : > { %v1464_v43 = vsub.s32 %v2975_v13, %v1463_v41  ;;  %vm1647_vm4 = vmor %vm1642_vm13, %vm1645_vm14 }
 0x20b   : > { %v1206_v59 = vpop.permute.xlu1 %1205  ;;  %v1204_v55 = vpop.permute.xlu0 %1203  ;;  %v1467_v44 = vadd.s32 16, %v1464_v43  ;;  %vm1466_vm5 = vcmp.eq.s32.totalorder %v2980_v14, %v1464_v43  ;;  %vm1465_vm7 = vcmp.eq.s32.totalorder %v2955_v54, %v1464_v43 }
 0x20c   : > { %v1210_v11 = vadd.f32 %v1206_v59, %v1189_v63  ;;  %v1209_v46 = vadd.f32 %v1204_v55, %v1188_v0  ;;  %v1819_v59 = vadd.s32 16, %v1816_v52 }
 0x20d   : > { %vm1469_vm6 = vcmp.eq.s32.totalorder %v2980_v14, %v1467_v44  ;;  %vm1468_vm8 = vcmp.eq.s32.totalorder %v2955_v54, %v1467_v44 }
 0x20e   : > { %vm1471_vm9 = vmor %vm1466_vm5, %vm1469_vm6  ;;  %vm1821_vm2 = vcmp.eq.s32.totalorder %v2980_v14, %v1819_v59  ;;  %vm1817_vm5 = vcmp.eq.s32.totalorder %v2955_v54, %v1816_v52  ;;  %vm1820_vm6 = vcmp.eq.s32.totalorder %v2955_v54, %v1819_v59 }
 0x20f   : > { %vm1470_vm10 = vmor %vm1465_vm7, %vm1468_vm8 }
 0x210   : > { %vm1823_vm7 = vmor %vm1818_vm1, %vm1821_vm2 }
 0x211   : > { %vm1822_vm8 = vmor %vm1817_vm5, %vm1820_vm6 }
 0x217   : > { %v1227_v40 = vpop.permute.xlu1 %1226  ;;  %v1225_v60 = vpop.permute.xlu0 %1224 }
 0x218   : > { %v1231_v4 = vadd.f32 %v1227_v40, %v1210_v11  ;;  %v1230_v51 = vadd.f32 %v1225_v60, %v1209_v46 }
 0x21b   : > { %v1248_v12 = vpop.permute.xlu1 %1247  ;;  %v1246_v2 = vpop.permute.xlu0 %1245 }
 0x21c   : > { %v1252_v5 = vadd.f32 %v1248_v12, %v1231_v4  ;;  %v1251_v34 = vadd.f32 %v1246_v2, %v1230_v51 }
 0x223   : > { %v1269_v6 = vpop.permute.xlu1 %1268  ;;  %v1267_v7 = vpop.permute.xlu0 %1266 }
 0x224   : > { %v1273_v8 = vadd.f32 %v1269_v6, %v1252_v5  ;;  %v1272_v49 = vadd.f32 %v1267_v7, %v1251_v34 }
 0x226   : > { %1478 = vrot.lane.b32.xlu1 %v1273_v8, %s2411_s17  ;;  %2172 = vmatpush3.msra.mxu0 %v1273_v8 }
 0x227   : > { %1476 = vrot.lane.b32.xlu0 %v1272_v49, %s2411_s17  ;;  %2173 = vmatprep.subr.mxu0 %v2393_v3 }
 0x228   : > { %2174 = vmatpush3.msra.mxu0 %v1272_v49 }
 0x229   : > { %2176 = vmatmul.mubr.msk.f32.vlgmr.msra.gmra.mxu0 %vm1304_vm3, %v1290_v10  ;;  %2185 = vmatprep.subr.mxu0 %v2393_v3 }
 0x22a   : > { %1653 = vrot.lane.b32.xlu1 %v1273_v8, %s2412_s30  ;;  %2189 = vmatprep.mubr.msk.f32.mxu0 %vm2410_vm15, %v2393_v3 }
 0x22b   : > { %1651 = vrot.lane.b32.xlu0 %v1272_v49, %s2412_s30  ;;  %s3078_s30 = scalar_lea.hbm %s3125_s4, %s2146_s16 }
 0x22e   : > { %1828 = vrot.lane.b32.xlu1 %v1273_v8, %s2413_s18 }
 0x22f   : > { %1826 = vrot.lane.b32.xlu0 %v1272_v49, %s2413_s18  ;;  %s3081_s18 = scalar_lea.sflag [#allocation7], %s146_s13 }
 0x298   : > { %v1479_v32 = vpop.permute.xlu1 %1478 }
 0x299   : > { %v1477_v33 = vpop.permute.xlu0 %1476  ;;  %2186 = vmatpush3.msra.mxu0 %v1479_v32 }
 0x29a   : > { %2187 = vmatprep.subr.mxu0 %v2393_v3 }
 0x29b   : > { %2188 = vmatpush3.msra.mxu0 %v1477_v33 }
 0x29c   : > { %v1654_v37 = vpop.permute.xlu1 %1653  ;;  %2190 = vmatmul.mubr.msk.f32.vlgmr.msra.gmra.mxu0 %vm1304_vm3, %v1462_v36  ;;  %2199 = vmatprep.subr.mxu0 %v2393_v3 }
 0x29d   : > { %v1652_v27 = vpop.permute.xlu0 %1651  ;;  %2200 = vmatpush3.msra.mxu0 %v1654_v37  ;;  %2203 = vmatprep.mubr.msk.f32.mxu0 %vm2410_vm15, %v2393_v3 }
 0x29e   : > { %2201 = vmatprep.subr.mxu0 %v2393_v3 }
 0x29f   : > { %2202 = vmatpush3.msra.mxu0 %v1652_v27 }
 0x2a0   : > { %v1829_v16 = vpop.permute.xlu1 %1828  ;;  %2204 = vmatmul.mubr.msk.f32.vlgmr.msra.gmra.mxu0 %vm1304_vm3, %v1639_v38  ;;  %2213 = vmatprep.subr.mxu0 %v2393_v3 }
 0x2a1   : > { %2214 = vmatpush3.msra.mxu0 %v1829_v16  ;;  %2217 = vmatprep.mubr.msk.f32.mxu0 %vm2410_vm15, %v2393_v3  ;;  %v1827_v39 = vpop.permute.xlu0 %1826 }
 0x2a2   : > { %2215 = vmatprep.subr.mxu0 %v2393_v3 }
 0x2a3   : > { %2216 = vmatpush3.msra.mxu0 %v1827_v39 }
 0x2a4   : > { %2218 = vmatmul.mubr.msk.f32.vlgmr.msra.gmra.mxu0 %vm1304_vm3, %v1814_v29 }
 0x2e9   : > { %v1374_v45 = vpop.f32.mrf.mxu0 }
 0x2ea   : > { %2183 = vmatmul.mubr.msk.f32.vlgmr.msra.gmra.mxu1 %vm1304_vm3, %v1374_v45 }
 0x2eb   : > { %v2177_v47 = vpop.f32.mrf.mxu0  ;;  %2193 = vmatpush3.msk.msra.mxu1 %vm1471_vm9, %v2414_v21  ;;  %2196 = vmatprep.mubr.msk.f32.mxu1 %vm2410_vm15, %v2393_v3  ;;  %vm1451_vm9 = vcmask 27648  }
 0x2ec   : > { %2194 = vmatprep.subr.mxu1 %v2393_v3 }
 0x2ed   : > { %2195 = vmatpush3.msk.msra.mxu1 %vm1470_vm10, %v2414_v21 }
 0x2ee   : > { %2206 = vmatprep.subr.mxu1 %v2393_v3 }
 0x35c   : > { %v1551_v55 = vpop.f32.mrf.mxu0 }
 0x35d   : > { %2197 = vmatmul.mubr.msk.f32.vlgmr.msra.gmra.mxu1 %vm1304_vm3, %v1551_v55 }
 0x35e   : > { %v2191_v56 = vpop.f32.mrf.mxu0  ;;  %2207 = vmatpush3.msk.msra.mxu1 %vm1648_vm0, %v2414_v21  ;;  %2210 = vmatprep.mubr.msk.f32.mxu1 %vm2410_vm15, %v2393_v3 }
 0x35f   : > { %2208 = vmatprep.subr.mxu1 %v2393_v3 }
 0x360   : > { %v1726_v57 = vpop.f32.mrf.mxu0  ;;  %2209 = vmatpush3.msk.msra.mxu1 %vm1647_vm4, %v2414_v21 }
 0x361   : > { %2211 = vmatmul.mubr.msk.f32.vlgmr.msra.gmra.mxu1 %vm1304_vm3, %v1726_v57  ;;  %2220 = vmatprep.subr.mxu1 %v2393_v3 }
 0x362   : > { %v2205_v58 = vpop.f32.mrf.mxu0  ;;  %2221 = vmatpush3.msk.msra.mxu1 %vm1823_vm7, %v2414_v21  ;;  %2224 = vmatprep.mubr.msk.f32.mxu1 %vm2410_vm15, %v2393_v3 }
 0x363   : > { %2222 = vmatprep.subr.mxu1 %v2393_v3 }
 0x364   : > { %v1901_v54 = vpop.f32.mrf.mxu0  ;;  %2223 = vmatpush3.msk.msra.mxu1 %vm1822_vm8, %v2414_v21 }
 0x365   : > { %2225 = vmatmul.mubr.msk.f32.vlgmr.msra.gmra.mxu1 %vm1304_vm3, %v1901_v54 }
 0x366   : > { %v2219_v42 = vpop.f32.mrf.mxu0 }
 0x3aa   : > { %v1447_v40 = vpop.f32.mrf.mxu1 }
 0x3ab   : > { %1452 = vst.msk [vmem:[%s148_s20] sm:$0xf] %vm1451_vm9, %v1447_v40 }
 0x3ac   : > { %v2184_v60 = vpop.f32.mrf.mxu1 }
 0x41d   : > { %v1624_v61 = vpop.f32.mrf.mxu1 }
 0x41e   : > { %2129 = vst.msk [vmem:[%s148_s20 + $0x4] sm:$0xf] %vm1451_vm9, %v1624_v61 }
 0x41f   : > { %v2198_v3 = vpop.f32.mrf.mxu1 }
 0x421   : > { %v1799_v62 = vpop.f32.mrf.mxu1 }
 0x422   : > { %2134 = vst.msk [vmem:[%s148_s20 + $0x8] sm:$0xf] %vm1451_vm9, %v1799_v62 }
 0x423   : > { %v2212_v63 = vpop.f32.mrf.mxu1 }
 0x425   : > { %v1974_v0 = vpop.f32.mrf.mxu1 }
 0x426   : > { %2139 = vst.msk [vmem:[%s148_s20 + $0xc] sm:$0xf] %vm1451_vm9, %v1974_v0 }
 0x427   : > { %v2226_v1 = vpop.f32.mrf.mxu1 }
 0x428   : > { %2339 = shalt.err (!%p2336_p13)
}
 0x429   : > { %s2340_s15 = scalar_lea.hbm %s3078_s30, 256  ;;  %s2344_s9 = scalar_lea.hbm %s3125_s4, 512 }
 0x42a   : > { %p2341_p0 = scmp.ne.s32.totalorder %s3078_s30, %s2340_s15  ;;  %p2345_p5 = scmp.lt.s32.totalorder %s3078_s30, %s3125_s4 }
 0x42b   : > { %p2346_p6 = scmp.lt.s32.totalorder %s2344_s9, %s2340_s15 }
 0x42c   : > { %p2342_p3 = pnand %p2341_p0, %p2486_p1 }
 0x42d   : > { %p2347_p7 = por %p2346_p6, %p2345_p5 }
 0x42e   : > { %p2343_p4 = pneg %p2342_p3 }
 0x430   : > { %p2348_p8 = pnand %p2347_p7, %p2343_p4 }
 0x432   : > { %2351 = shalt.err (!%p2348_p8)
}
 0x433   : > { %s2416_s13 = smov 64  }
 0x434   : > { %2227 = dma.vmem_to_hbm [thread:$0]  (%p2486_p1), %s3073_s12, 256, %s3078_s30, %s3081_s18, %s2416_s13, %s2416_s13, %s2400_s23  }
 0x435 PF: > { %p2233_p9 = scmp.ge.s32.totalorder %s2388_s26, 2  ;;  %s2009_s14 = sand.u32 1, %s2376_s1  }
 0x436   : > { %s2010_s20 = scalar_lea.sflag [#allocation7], %s2009_s14 }
 0x437   : > { %p2230_p10 = pnand %p2233_p9, %p2490_p2 }
 0x439   : > { %p2231_p11 = pneg %p2230_p10 }
 0x43b   : > { %2371 = dma.done.wait (%p2231_p11), %s2010_s20, 256  }
 0x43c   : > { %2373 = vsyncadd (%p2231_p11), %s2010_s20, 4294967040  ;;  %p24_p12 = scmp.ge.s32.totalorder %s2473_s29, 4   ;;  %s3129_s1 = smov %s2380_s24 }
 0x43d   : > { %s3130_s24 = smov %s2384_s25  ;;  %s3131_s25 = smov %s2484_s6 }
 0x43e   : > { %s3132_s26 = smov %s2473_s29  ;;  %26 = sbr.rel (!%p24_p12) target bundleno = 28 (0x1c), region = 69 }
 0x443   :  { %2015 = vsyncpa [#allocation7], 1 }
 0x444   :  { %2017 = vsyncpa [#allocation7 + $0x1], 1 }

</bundles_post_ra>
